<compile_context>
chip_gen: v7x
topology: tpu7x:2x2x1
jax: 0.10.0
libtpu: 0.0.40
codegen_flags: <defaults>
</compile_context>

<pallas_src>
import math
import functools

import jax
import jax.numpy as jnp
from jax.experimental import pallas as pl
from jax.experimental.pallas import tpu as pltpu


LANE = 128      # TPU lane width: kernel feature dims padded to a multiple of this
EPS = 1e-5      # torch.nn.LayerNorm default


def _round_up(n, m):
    return ((n + m - 1) // m) * m


# ------------------------------- fused kernel -------------------------------

def encoder_stack_kernel(
    x0_hbm,                        # (R, Dp)    f32   embeddings + PE, HBM (pl.ANY)
    wqkv_ref,                      # (1, Dp, 3Da) bf16
    wo_ref,                        # (1, Da, Dp)  bf16
    w1_ref,                        # (1, Dp, Fp)  bf16
    w2_ref,                        # (1, Fp, Dp)  bf16
    vec_ref,                       # (1, 8, W)    f32  packed biases / LN params
    o_ref,                         # (R, Dp)      f32  resident activations / output
    x0_sem,                        # DMA semaphore (scratch)
    *, batch, seq, heads, d_real, d_head_pad, scale,
):
    layer = pl.program_id(0)
    R, Dp = o_ref.shape
    Da = heads * d_head_pad        # attention inner width (head slots 128-aligned)
    Fp = w1_ref.shape[2]

    # Layer 0: DMA the embedded input straight from HBM into the resident
    # activation buffer (no pipelined staging buffer for x0).
    @pl.when(layer == 0)
    def _():
        cp = pltpu.make_async_copy(x0_hbm, o_ref, x0_sem)
        cp.start()
        cp.wait()

    x = o_ref[...]                                            # (R, Dp) f32

    # Packed per-layer vectors: one DMA stream, sliced on (sublane, lane) here.
    vecs = vec_ref[0]                                         # (8, W) f32
    bqkv = vecs[0:1, 0:3 * Da]
    bo = vecs[1:2, 0:Dp]
    g1 = vecs[2:3, 0:Dp]
    be1 = vecs[3:4, 0:Dp]
    b1 = vecs[4:5, 0:Fp]
    b2 = vecs[5:6, 0:Dp]
    g2 = vecs[6:7, 0:Dp]
    be2 = vecs[7:8, 0:Dp]

    # Lane mask over the real (unpadded) model dim -> exact LayerNorm stats.
    # (Padded lanes of every residual-stream tensor are kept exactly zero:
    #  wo/w2 columns, bo/b2, gamma/beta are zero-padded and layernorm() below
    #  re-zeroes them via lane_mask.)
    lane_id = jax.lax.broadcasted_iota(jnp.int32, (1, Dp), 1)
    lane_mask = (lane_id < d_real).astype(jnp.float32)
    inv_d = 1.0 / d_real

    def layernorm(y, gamma, beta):
        mu = jnp.sum(y, axis=-1, keepdims=True) * inv_d
        yc = (y - mu) * lane_mask                             # padded lanes -> 0
        var = jnp.sum(yc * yc, axis=-1, keepdims=True) * inv_d
        return yc * jax.lax.rsqrt(var + EPS) * gamma + beta

    # ---- fused Q/K/V projection on (B*S) folded rows (one MXU matmul) ----
    # Cast to bf16 right after the bias add: halves the largest temporary and
    # the MXU consumes bf16 anyway.
    qkv = (jnp.dot(x.astype(jnp.bfloat16), wqkv_ref[0],
                   preferred_element_type=jnp.float32) + bqkv).astype(jnp.bfloat16)
    q = qkv[:, 0 * Da:1 * Da].reshape(batch, seq, Da)
    k = qkv[:, 1 * Da:2 * Da].reshape(batch, seq, Da)
    v = qkv[:, 2 * Da:3 * Da].reshape(batch, seq, Da)

    # ---- per-head scaled-dot-product attention, batched over B ----
    # Head slots are 128-lane aligned, so each slice / the concat below is a
    # whole-lane-tile selection (no cross-lane relayout) and each matmul
    # contracts over a full 128-deep MXU pass.
    ctx_heads = []
    for h in range(heads):                                    # static unroll
        lo = h * d_head_pad
        qh = q[:, :, lo:lo + d_head_pad]
        kh = k[:, :, lo:lo + d_head_pad]
        vh = v[:, :, lo:lo + d_head_pad]
        s = jnp.einsum('bqd,bkd->bqk', qh, kh,
                       preferred_element_type=jnp.float32) * scale   # (B,S,S) f32
        s = s - jnp.max(s, axis=-1, keepdims=True)
        p = jnp.exp(s)
        p = p * pl.reciprocal(jnp.sum(p, axis=-1, keepdims=True), approx=True)
        ctx_heads.append(jnp.einsum('bqk,bkd->bqd', p.astype(jnp.bfloat16), vh,
                                    preferred_element_type=jnp.float32))
    ctx = jnp.concatenate(ctx_heads, axis=-1).reshape(R, Da)          # (R, Da) f32

    # ---- output projection + residual(value == x) + LayerNorm ----
    attn = jnp.dot(ctx.astype(jnp.bfloat16), wo_ref[0],
                   preferred_element_type=jnp.float32) + bo
    h1 = layernorm(attn + x, g1, be1)                         # dropout == identity

    # ---- feed-forward: Linear -> ReLU -> Linear, rows folded ----
    f = jnp.dot(h1.astype(jnp.bfloat16), w1_ref[0],
                preferred_element_type=jnp.float32) + b1
    f = jnp.maximum(f, 0.0).astype(jnp.bfloat16)              # bf16 intermediate
    f = jnp.dot(f, w2_ref[0], preferred_element_type=jnp.float32) + b2

    # ---- residual + final LayerNorm; activations stay resident in VMEM ----
    o_ref[...] = layernorm(f + h1, g2, be2)


# ------------------------------ host wrappers --------------------------------

_PARAM_ORDER = ("wqkv", "wo", "w1", "w2", "vecs")


def encoder_stack(x_pad, stacked, *, batch, seq, heads, d_real, d_head_pad):
    """x_pad: (B*S, Dp) f32 -> (B*S, Dp) f32.  One pallas_call over all layers."""
    R, Dp = x_pad.shape
    num_layers = stacked["wqkv"].shape[0]
    weights = [stacked[name] for name in _PARAM_ORDER]
    Da = heads * d_head_pad
    Fp = stacked["w1"].shape[2]

    def wspec(arr):
        return pl.BlockSpec((1,) + arr.shape[1:], lambda l: (l, 0, 0))

    # x0 is NOT pipelined: raw HBM ref, DMA'd into o_ref at layer 0.
    in_specs = [pl.BlockSpec(memory_space=pl.ANY)] + [wspec(w) for w in weights]
    out_spec = pl.BlockSpec((R, Dp), lambda l: (0, 0))   # resident across layer axis

    # VMEM budget: double-buffered streamed weights + resident activations +
    # f32/bf16 temporaries, with generous headroom (clamped to [32, 128] MiB).
    bytes_per_layer = sum(math.prod(w.shape[1:]) * w.dtype.itemsize for w in weights)
    act_bytes = R * Dp * 4
    tmp_bytes = R * max(3 * Da, Fp) * 4 * 3
    vmem_limit = int(min(max(2 * bytes_per_layer + act_bytes + tmp_bytes + (16 << 20),
                             32 << 20), 128 << 20))

    kernel = functools.partial(
        encoder_stack_kernel, batch=batch, seq=seq, heads=heads,
        d_real=d_real, d_head_pad=d_head_pad,
        scale=1.0 / math.sqrt(d_real // heads))

    return pl.pallas_call(
        kernel,
        out_shape=jax.ShapeDtypeStruct((R, Dp), jnp.float32),
        grid=(num_layers,),
        in_specs=in_specs,
        out_specs=out_spec,
        scratch_shapes=[pltpu.SemaphoreType.DMA(())],
        compiler_params=pltpu.CompilerParams(
            dimension_semantics=("arbitrary",),
            vmem_limit_bytes=vmem_limit),
    )(x_pad, *weights)


def sinusoidal_pe(seq_len, d_model):
    pos = jnp.arange(seq_len, dtype=jnp.float32)[:, None]
    i = jnp.arange(0, d_model, 2, dtype=jnp.float32)[None, :]
    angle = pos / jnp.power(10000.0, i / d_model)
    pe = jnp.zeros((seq_len, d_model), jnp.float32)
    pe = pe.at[:, 0::2].set(jnp.sin(angle))
    pe = pe.at[:, 1::2].set(jnp.cos(angle))
    return pe


def init_block_params(key, d_model, expansion):
    ks = jax.random.split(key, 8)
    std = 0.02
    d_ff = expansion * d_model

    def lin(k, fan_in, fan_out):      # stored (in, out): kernel computes x @ W + b
        return jax.random.normal(k, (fan_in, fan_out), jnp.float32) * std

    return dict(
        wq=lin(ks[0], d_model, d_model), bq=jnp.zeros((1, d_model), jnp.float32),
        wk=lin(ks[1], d_model, d_model), bk=jnp.zeros((1, d_model), jnp.float32),
        wv=lin(ks[2], d_model, d_model), bv=jnp.zeros((1, d_model), jnp.float32),
        wo=lin(ks[3], d_model, d_model), bo=jnp.zeros((1, d_model), jnp.float32),
        g1=jnp.ones((1, d_model), jnp.float32), be1=jnp.zeros((1, d_model), jnp.float32),
        g2=jnp.ones((1, d_model), jnp.float32), be2=jnp.zeros((1, d_model), jnp.float32),
        w1=lin(ks[4], d_model, d_ff), b1=jnp.zeros((1, d_ff), jnp.float32),
        w2=lin(ks[5], d_ff, d_model), b2=jnp.zeros((1, d_model), jnp.float32),
    )


def _pad_block_params(p, d_model, heads, Dp, Fp, d_head_pad, W):
    """Zero-pad real params to lane-dense padded shapes.

    Q/K/V columns and Wo rows of each head are placed in a 128-lane-aligned
    head slot of width d_head_pad, so in-kernel head slices need no cross-lane
    relayout and each attention matmul contracts over a full MXU pass.
    """
    d_head = d_model // heads
    Da = heads * d_head_pad

    def qkv_cols(w):        # (d, d): real head-h cols -> padded cols [h*dhp, h*dhp+dh)
        wp = jnp.zeros((Dp, Da), jnp.float32)
        for h in range(heads):
            wp = wp.at[:d_model, h * d_head_pad:h * d_head_pad + d_head].set(
                w[:, h * d_head:(h + 1) * d_head])
        return wp

    def qkv_vec(b):
        bp = jnp.zeros((1, Da), jnp.float32)
        for h in range(heads):
            bp = bp.at[:, h * d_head_pad:h * d_head_pad + d_head].set(
                b[:, h * d_head:(h + 1) * d_head])
        return bp

    def wo_rows(w):         # Wo: real head-h rows -> padded rows [h*dhp, h*dhp+dh)
        wp = jnp.zeros((Da, Dp), jnp.float32)
        for h in range(heads):
            wp = wp.at[h * d_head_pad:h * d_head_pad + d_head, :d_model].set(
                w[h * d_head:(h + 1) * d_head, :])
        return wp

    def pad2(w, r, c):
        return jnp.zeros((r, c), jnp.float32).at[:w.shape[0], :w.shape[1]].set(w)

    wqkv = jnp.concatenate(
        [qkv_cols(p["wq"]), qkv_cols(p["wk"]), qkv_cols(p["wv"])], axis=1)   # (Dp, 3Da)
    bqkv = jnp.concatenate(
        [qkv_vec(p["bq"]), qkv_vec(p["bk"]), qkv_vec(p["bv"])], axis=1)      # (1, 3Da)

    # Pack the 8 small per-layer vectors into one (8, W) slab -> single DMA stream.
    vecs = jnp.zeros((8, W), jnp.float32)
    vecs = vecs.at[0, :3 * Da].set(bqkv[0])
    vecs = vecs.at[1, :Dp].set(pad2(p["bo"], 1, Dp)[0])
    vecs = vecs.at[2, :Dp].set(pad2(p["g1"], 1, Dp)[0])
    vecs = vecs.at[3, :Dp].set(pad2(p["be1"], 1, Dp)[0])
    vecs = vecs.at[4, :Fp].set(pad2(p["b1"], 1, Fp)[0])
    vecs = vecs.at[5, :Dp].set(pad2(p["b2"], 1, Dp)[0])
    vecs = vecs.at[6, :Dp].set(pad2(p["g2"], 1, Dp)[0])
    vecs = vecs.at[7, :Dp].set(pad2(p["be2"], 1, Dp)[0])

    return dict(
        wqkv=wqkv.astype(jnp.bfloat16),
        wo=wo_rows(p["wo"]).astype(jnp.bfloat16),
        w1=pad2(p["w1"], Dp, Fp).astype(jnp.bfloat16),
        w2=pad2(p["w2"], Fp, Dp).astype(jnp.bfloat16),
        vecs=vecs,
    )


def stack_block_params(block_params, d_model, heads, expansion):
    assert d_model % heads == 0
    d_ff = expansion * d_model
    Dp = _round_up(d_model, LANE)
    Fp = _round_up(d_ff, LANE)
    d_head_pad = _round_up(d_model // heads, LANE)
    W = max(3 * heads * d_head_pad, Fp, Dp)
    padded = [_pad_block_params(p, d_model, heads, Dp, Fp, d_head_pad, W)
              for p in block_params]
    stacked = {k: jnp.stack([pp[k] for pp in padded], axis=0) for k in padded[0]}
    return stacked, Dp, d_head_pad


def encoder_forward(tokens, emb_table, pe, stacked_params, Dp, d_head_pad, heads):
    """tokens: (B, S) int32 -> (B, S, D) f32."""
    B, S = tokens.shape
    d_model = emb_table.shape[1]
    # Embedding lookup + positional encoding (glue, plain JAX).
    # TODO(synk): exact Embedding/PositionalEncoding source not provided; using the
    # standard sqrt(d_model)-scaled embedding + sinusoidal PE convention.
    x = emb_table[tokens] * jnp.sqrt(jnp.float32(d_model)) + pe[None, :, :]
    x_rows = x.reshape(B * S, d_model)
    x_pad = jnp.zeros((B * S, Dp), jnp.float32).at[:, :d_model].set(x_rows)
    out_pad = encoder_stack(x_pad, stacked_params, batch=B, seq=S, heads=heads,
                            d_real=d_model, d_head_pad=d_head_pad)
    return out_pad[:, :d_model].reshape(B, S, d_model)


# ---------------------------------- main -------------------------------------

if __name__ == "__main__":
    B, S = 2, 8                     # batch, panjang_sekuens
    VOCAB = 50                      # ukuran_vocab
    D = 32                          # dimensi_embedding
    HEADS = 4                       # heads (D % HEADS == 0)
    EXPANSION = 4                   # faktor_ekspansi
    NUM_BLOCKS = 2                  # jumlah_block (small for the demo)

    key = jax.random.PRNGKey(0)
    k_tok, k_emb, k_blk = jax.random.split(key, 3)

    tokens = jax.random.randint(k_tok, (B, S), 0, VOCAB, dtype=jnp.int32)
    emb_table = jax.random.normal(k_emb, (VOCAB, D), jnp.float32) * 0.02
    pe = sinusoidal_pe(S, D)
    block_params = [init_block_params(jax.random.fold_in(k_blk, i), D, EXPANSION)
                    for i in range(NUM_BLOCKS)]
    stacked, Dp, d_head_pad = stack_block_params(block_params, D, HEADS, EXPANSION)

    out = encoder_forward(tokens, emb_table, pe, stacked, Dp, d_head_pad, HEADS)
    out = jax.block_until_ready(out)

    assert out.shape == (B, S, D), out.shape
    assert bool(jnp.all(jnp.isfinite(out)))
    print("KERNEL_OK")
</pallas_src>

<mosaic_0001>
module attributes {stable_mosaic.version = 11 : i64} {
  func.func @encoder_stack_kernel(%arg0: i32, %arg1: memref<16x128xf32, #tpu.memory_space<any>>, %arg2: memref<1x128x1536xbf16, #tpu.memory_space<vmem>>, %arg3: memref<1x512x128xbf16, #tpu.memory_space<vmem>>, %arg4: memref<1x128x128xbf16, #tpu.memory_space<vmem>>, %arg5: memref<1x128x128xbf16, #tpu.memory_space<vmem>>, %arg6: memref<1x8x1536xf32, #tpu.memory_space<vmem>>, %arg7: memref<16x128xf32, #tpu.memory_space<vmem>>, %arg8: memref<!tpu.dma_semaphore, #tpu.memory_space<semaphore_mem>>) attributes {dimension_semantics = [#tpu.dimension_semantics<arbitrary>], iteration_bounds = array<i64: 2>, scalar_prefetch = 0 : i64, scratch_operands = 1 : i64, tpu.core_type = #tpu.core_type<tc>, window_params = [{}, {transform_indices = @transform_1, window_bounds = array<i64: 1, 128, 1536>}, {transform_indices = @transform_2, window_bounds = array<i64: 1, 512, 128>}, {transform_indices = @transform_3, window_bounds = array<i64: 1, 128, 128>}, {transform_indices = @transform_4, window_bounds = array<i64: 1, 128, 128>}, {transform_indices = @transform_5, window_bounds = array<i64: 1, 8, 1536>}, {pipeline_mode = #tpu.pipeline_mode<synchronous>, transform_indices = @transform_6, window_bounds = array<i64: 16, 128>}]} {
    %c0_i32 = arith.constant 0 : i32
    %0 = arith.cmpi eq, %arg0, %c0_i32 : i32
    %1 = arith.extui %0 : i1 to i32
    %c0_i32_0 = arith.constant 0 : i32
    %2 = arith.cmpi ne, %1, %c0_i32_0 : i32
    scf.if %2 {
      tpu.enqueue_dma source(%arg1 : memref<16x128xf32, #tpu.memory_space<any>>) target(%arg7 : memref<16x128xf32, #tpu.memory_space<vmem>>) target_semaphore(%arg8 : memref<!tpu.dma_semaphore, #tpu.memory_space<semaphore_mem>>)
      tpu.wait_dma2 semaphore(%arg8 : memref<!tpu.dma_semaphore, #tpu.memory_space<semaphore_mem>>) src(%arg1 : memref<16x128xf32, #tpu.memory_space<any>>) dst(%arg7 : memref<16x128xf32, #tpu.memory_space<vmem>>)
    } else {
    }
    %c0 = arith.constant 0 : index
    %c0_1 = arith.constant 0 : index
    %3 = vector.load %arg7[%c0, %c0_1] : memref<16x128xf32, #tpu.memory_space<vmem>>, vector<16x128xf32>
    %c0_2 = arith.constant 0 : index
    %c0_3 = arith.constant 0 : index
    %c0_4 = arith.constant 0 : index
    %4 = vector.load %arg6[%c0_2, %c0_3, %c0_4] : memref<1x8x1536xf32, #tpu.memory_space<vmem>>, vector<1x8x1536xf32>
    %5 = vector.shape_cast %4 : vector<1x8x1536xf32> to vector<8x1536xf32>
    %6 = vector.extract_strided_slice %5 {offsets = [0, 0], sizes = [1, 1536], strides = [1, 1]} : vector<8x1536xf32> to vector<1x1536xf32>
    %7 = vector.extract_strided_slice %5 {offsets = [1, 0], sizes = [1, 128], strides = [1, 1]} : vector<8x1536xf32> to vector<1x128xf32>
    %8 = vector.extract_strided_slice %5 {offsets = [2, 0], sizes = [1, 128], strides = [1, 1]} : vector<8x1536xf32> to vector<1x128xf32>
    %9 = vector.extract_strided_slice %5 {offsets = [3, 0], sizes = [1, 128], strides = [1, 1]} : vector<8x1536xf32> to vector<1x128xf32>
    %10 = vector.extract_strided_slice %5 {offsets = [4, 0], sizes = [1, 128], strides = [1, 1]} : vector<8x1536xf32> to vector<1x128xf32>
    %11 = vector.extract_strided_slice %5 {offsets = [5, 0], sizes = [1, 128], strides = [1, 1]} : vector<8x1536xf32> to vector<1x128xf32>
    %12 = vector.extract_strided_slice %5 {offsets = [6, 0], sizes = [1, 128], strides = [1, 1]} : vector<8x1536xf32> to vector<1x128xf32>
    %13 = vector.extract_strided_slice %5 {offsets = [7, 0], sizes = [1, 128], strides = [1, 1]} : vector<8x1536xf32> to vector<1x128xf32>
    %14 = tpu.iota {dimensions = array<i32: 1>} : vector<1x128xi32>
    %c32_i32 = arith.constant 32 : i32
    %15 = vector.broadcast %c32_i32 : i32 to vector<1x128xi32>
    %16 = arith.cmpi slt, %14, %15 : vector<1x128xi32>
    %17 = arith.extui %16 : vector<1x128xi1> to vector<1x128xi32>
    %18 = arith.sitofp %17 : vector<1x128xi32> to vector<1x128xf32>
    %19 = arith.truncf %3 : vector<16x128xf32> to vector<16x128xbf16>
    %c0_5 = arith.constant 0 : index
    %c0_6 = arith.constant 0 : index
    %c0_7 = arith.constant 0 : index
    %20 = vector.load %arg2[%c0_5, %c0_6, %c0_7] : memref<1x128x1536xbf16, #tpu.memory_space<vmem>>, vector<1x128x1536xbf16>
    %21 = vector.shape_cast %20 : vector<1x128x1536xbf16> to vector<128x1536xbf16>
    %cst = arith.constant dense<0.000000e+00> : vector<16x1536xf32>
    %22 = tpu.matmul %19, %21, %cst {dimension_numbers = #tpu.dot_dimension_numbers<[1], [0], [0], [1], [0, 0, 1, 1], [], []>} : vector<16x128xbf16>, vector<128x1536xbf16>, vector<16x1536xf32> -> vector<16x1536xf32>
    %23 = vector.broadcast %6 : vector<1x1536xf32> to vector<16x1536xf32>
    %24 = arith.addf %22, %23 : vector<16x1536xf32>
    %25 = arith.truncf %24 : vector<16x1536xf32> to vector<16x1536xbf16>
    %26 = vector.extract_strided_slice %25 {offsets = [0, 0], sizes = [16, 512], strides = [1, 1]} : vector<16x1536xbf16> to vector<16x512xbf16>
    %27 = vector.shape_cast %26 : vector<16x512xbf16> to vector<2x8x512xbf16>
    %28 = vector.extract_strided_slice %25 {offsets = [0, 512], sizes = [16, 512], strides = [1, 1]} : vector<16x1536xbf16> to vector<16x512xbf16>
    %29 = vector.shape_cast %28 : vector<16x512xbf16> to vector<2x8x512xbf16>
    %30 = vector.extract_strided_slice %25 {offsets = [0, 1024], sizes = [16, 512], strides = [1, 1]} : vector<16x1536xbf16> to vector<16x512xbf16>
    %31 = vector.shape_cast %30 : vector<16x512xbf16> to vector<2x8x512xbf16>
    %32 = vector.extract_strided_slice %27 {offsets = [0, 0, 0], sizes = [2, 8, 128], strides = [1, 1, 1]} : vector<2x8x512xbf16> to vector<2x8x128xbf16>
    %33 = vector.extract_strided_slice %29 {offsets = [0, 0, 0], sizes = [2, 8, 128], strides = [1, 1, 1]} : vector<2x8x512xbf16> to vector<2x8x128xbf16>
    %34 = vector.extract_strided_slice %31 {offsets = [0, 0, 0], sizes = [2, 8, 128], strides = [1, 1, 1]} : vector<2x8x512xbf16> to vector<2x8x128xbf16>
    "tpu.trace_start"() <{level = 10 : i32, message = "bqd,bkd->bqk"}> : () -> ()
    %cst_8 = arith.constant dense<0.000000e+00> : vector<2x8x8xf32>
    %35 = tpu.matmul %32, %33, %cst_8 {dimension_numbers = #tpu.dot_dimension_numbers<[2], [2], [1], [1], [0, 0, 0, 1, 1, 1], [0], [0]>} : vector<2x8x128xbf16>, vector<2x8x128xbf16>, vector<2x8x8xf32> -> vector<2x8x8xf32>
    "tpu.trace_stop"() : () -> ()
    %cst_9 = arith.constant 0.353553385 : f32
    %36 = vector.broadcast %cst_9 : f32 to vector<2x8x8xf32>
    %37 = arith.mulf %35, %36 : vector<2x8x8xf32>
    %cst_10 = arith.constant dense<0xFF800000> : vector<2x8xf32>
    %38 = vector.multi_reduction <maximumf>, %37, %cst_10 [2] : vector<2x8x8xf32> to vector<2x8xf32>
    %39 = vector.shape_cast %38 : vector<2x8xf32> to vector<2x8x1xf32>
    %40 = vector.broadcast %39 : vector<2x8x1xf32> to vector<2x8x8xf32>
    %41 = arith.subf %37, %40 : vector<2x8x8xf32>
    %42 = math.exp %41 : vector<2x8x8xf32>
    %cst_11 = arith.constant dense<0.000000e+00> : vector<2x8xf32>
    %43 = vector.multi_reduction <add>, %42, %cst_11 [2] : vector<2x8x8xf32> to vector<2x8xf32>
    %44 = vector.shape_cast %43 : vector<2x8xf32> to vector<2x8x1xf32>
    %45 = tpu.reciprocal %44 {approx = true} : vector<2x8x1xf32> -> vector<2x8x1xf32>
    %46 = vector.broadcast %45 : vector<2x8x1xf32> to vector<2x8x8xf32>
    %47 = arith.mulf %42, %46 : vector<2x8x8xf32>
    %48 = arith.truncf %47 : vector<2x8x8xf32> to vector<2x8x8xbf16>
    "tpu.trace_start"() <{level = 10 : i32, message = "bqk,bkd->bqd"}> : () -> ()
    %cst_12 = arith.constant dense<0.000000e+00> : vector<2x8x128xf32>
    %49 = tpu.matmul %48, %34, %cst_12 {dimension_numbers = #tpu.dot_dimension_numbers<[2], [1], [1], [2], [0, 0, 0, 1, 1, 2], [0], [0]>} : vector<2x8x8xbf16>, vector<2x8x128xbf16>, vector<2x8x128xf32> -> vector<2x8x128xf32>
    "tpu.trace_stop"() : () -> ()
    %50 = vector.extract_strided_slice %27 {offsets = [0, 0, 128], sizes = [2, 8, 128], strides = [1, 1, 1]} : vector<2x8x512xbf16> to vector<2x8x128xbf16>
    %51 = vector.extract_strided_slice %29 {offsets = [0, 0, 128], sizes = [2, 8, 128], strides = [1, 1, 1]} : vector<2x8x512xbf16> to vector<2x8x128xbf16>
    %52 = vector.extract_strided_slice %31 {offsets = [0, 0, 128], sizes = [2, 8, 128], strides = [1, 1, 1]} : vector<2x8x512xbf16> to vector<2x8x128xbf16>
    "tpu.trace_start"() <{level = 10 : i32, message = "bqd,bkd->bqk"}> : () -> ()
    %cst_13 = arith.constant dense<0.000000e+00> : vector<2x8x8xf32>
    %53 = tpu.matmul %50, %51, %cst_13 {dimension_numbers = #tpu.dot_dimension_numbers<[2], [2], [1], [1], [0, 0, 0, 1, 1, 1], [0], [0]>} : vector<2x8x128xbf16>, vector<2x8x128xbf16>, vector<2x8x8xf32> -> vector<2x8x8xf32>
    "tpu.trace_stop"() : () -> ()
    %cst_14 = arith.constant 0.353553385 : f32
    %54 = vector.broadcast %cst_14 : f32 to vector<2x8x8xf32>
    %55 = arith.mulf %53, %54 : vector<2x8x8xf32>
    %cst_15 = arith.constant dense<0xFF800000> : vector<2x8xf32>
    %56 = vector.multi_reduction <maximumf>, %55, %cst_15 [2] : vector<2x8x8xf32> to vector<2x8xf32>
    %57 = vector.shape_cast %56 : vector<2x8xf32> to vector<2x8x1xf32>
    %58 = vector.broadcast %57 : vector<2x8x1xf32> to vector<2x8x8xf32>
    %59 = arith.subf %55, %58 : vector<2x8x8xf32>
    %60 = math.exp %59 : vector<2x8x8xf32>
    %cst_16 = arith.constant dense<0.000000e+00> : vector<2x8xf32>
    %61 = vector.multi_reduction <add>, %60, %cst_16 [2] : vector<2x8x8xf32> to vector<2x8xf32>
    %62 = vector.shape_cast %61 : vector<2x8xf32> to vector<2x8x1xf32>
    %63 = tpu.reciprocal %62 {approx = true} : vector<2x8x1xf32> -> vector<2x8x1xf32>
    %64 = vector.broadcast %63 : vector<2x8x1xf32> to vector<2x8x8xf32>
    %65 = arith.mulf %60, %64 : vector<2x8x8xf32>
    %66 = arith.truncf %65 : vector<2x8x8xf32> to vector<2x8x8xbf16>
    "tpu.trace_start"() <{level = 10 : i32, message = "bqk,bkd->bqd"}> : () -> ()
    %cst_17 = arith.constant dense<0.000000e+00> : vector<2x8x128xf32>
    %67 = tpu.matmul %66, %52, %cst_17 {dimension_numbers = #tpu.dot_dimension_numbers<[2], [1], [1], [2], [0, 0, 0, 1, 1, 2], [0], [0]>} : vector<2x8x8xbf16>, vector<2x8x128xbf16>, vector<2x8x128xf32> -> vector<2x8x128xf32>
    "tpu.trace_stop"() : () -> ()
    %68 = vector.extract_strided_slice %27 {offsets = [0, 0, 256], sizes = [2, 8, 128], strides = [1, 1, 1]} : vector<2x8x512xbf16> to vector<2x8x128xbf16>
    %69 = vector.extract_strided_slice %29 {offsets = [0, 0, 256], sizes = [2, 8, 128], strides = [1, 1, 1]} : vector<2x8x512xbf16> to vector<2x8x128xbf16>
    %70 = vector.extract_strided_slice %31 {offsets = [0, 0, 256], sizes = [2, 8, 128], strides = [1, 1, 1]} : vector<2x8x512xbf16> to vector<2x8x128xbf16>
    "tpu.trace_start"() <{level = 10 : i32, message = "bqd,bkd->bqk"}> : () -> ()
    %cst_18 = arith.constant dense<0.000000e+00> : vector<2x8x8xf32>
    %71 = tpu.matmul %68, %69, %cst_18 {dimension_numbers = #tpu.dot_dimension_numbers<[2], [2], [1], [1], [0, 0, 0, 1, 1, 1], [0], [0]>} : vector<2x8x128xbf16>, vector<2x8x128xbf16>, vector<2x8x8xf32> -> vector<2x8x8xf32>
    "tpu.trace_stop"() : () -> ()
    %cst_19 = arith.constant 0.353553385 : f32
    %72 = vector.broadcast %cst_19 : f32 to vector<2x8x8xf32>
    %73 = arith.mulf %71, %72 : vector<2x8x8xf32>
    %cst_20 = arith.constant dense<0xFF800000> : vector<2x8xf32>
    %74 = vector.multi_reduction <maximumf>, %73, %cst_20 [2] : vector<2x8x8xf32> to vector<2x8xf32>
    %75 = vector.shape_cast %74 : vector<2x8xf32> to vector<2x8x1xf32>
    %76 = vector.broadcast %75 : vector<2x8x1xf32> to vector<2x8x8xf32>
    %77 = arith.subf %73, %76 : vector<2x8x8xf32>
    %78 = math.exp %77 : vector<2x8x8xf32>
    %cst_21 = arith.constant dense<0.000000e+00> : vector<2x8xf32>
    %79 = vector.multi_reduction <add>, %78, %cst_21 [2] : vector<2x8x8xf32> to vector<2x8xf32>
    %80 = vector.shape_cast %79 : vector<2x8xf32> to vector<2x8x1xf32>
    %81 = tpu.reciprocal %80 {approx = true} : vector<2x8x1xf32> -> vector<2x8x1xf32>
    %82 = vector.broadcast %81 : vector<2x8x1xf32> to vector<2x8x8xf32>
    %83 = arith.mulf %78, %82 : vector<2x8x8xf32>
    %84 = arith.truncf %83 : vector<2x8x8xf32> to vector<2x8x8xbf16>
    "tpu.trace_start"() <{level = 10 : i32, message = "bqk,bkd->bqd"}> : () -> ()
    %cst_22 = arith.constant dense<0.000000e+00> : vector<2x8x128xf32>
    %85 = tpu.matmul %84, %70, %cst_22 {dimension_numbers = #tpu.dot_dimension_numbers<[2], [1], [1], [2], [0, 0, 0, 1, 1, 2], [0], [0]>} : vector<2x8x8xbf16>, vector<2x8x128xbf16>, vector<2x8x128xf32> -> vector<2x8x128xf32>
    "tpu.trace_stop"() : () -> ()
    %86 = vector.extract_strided_slice %27 {offsets = [0, 0, 384], sizes = [2, 8, 128], strides = [1, 1, 1]} : vector<2x8x512xbf16> to vector<2x8x128xbf16>
    %87 = vector.extract_strided_slice %29 {offsets = [0, 0, 384], sizes = [2, 8, 128], strides = [1, 1, 1]} : vector<2x8x512xbf16> to vector<2x8x128xbf16>
    %88 = vector.extract_strided_slice %31 {offsets = [0, 0, 384], sizes = [2, 8, 128], strides = [1, 1, 1]} : vector<2x8x512xbf16> to vector<2x8x128xbf16>
    "tpu.trace_start"() <{level = 10 : i32, message = "bqd,bkd->bqk"}> : () -> ()
    %cst_23 = arith.constant dense<0.000000e+00> : vector<2x8x8xf32>
    %89 = tpu.matmul %86, %87, %cst_23 {dimension_numbers = #tpu.dot_dimension_numbers<[2], [2], [1], [1], [0, 0, 0, 1, 1, 1], [0], [0]>} : vector<2x8x128xbf16>, vector<2x8x128xbf16>, vector<2x8x8xf32> -> vector<2x8x8xf32>
    "tpu.trace_stop"() : () -> ()
    %cst_24 = arith.constant 0.353553385 : f32
    %90 = vector.broadcast %cst_24 : f32 to vector<2x8x8xf32>
    %91 = arith.mulf %89, %90 : vector<2x8x8xf32>
    %cst_25 = arith.constant dense<0xFF800000> : vector<2x8xf32>
    %92 = vector.multi_reduction <maximumf>, %91, %cst_25 [2] : vector<2x8x8xf32> to vector<2x8xf32>
    %93 = vector.shape_cast %92 : vector<2x8xf32> to vector<2x8x1xf32>
    %94 = vector.broadcast %93 : vector<2x8x1xf32> to vector<2x8x8xf32>
    %95 = arith.subf %91, %94 : vector<2x8x8xf32>
    %96 = math.exp %95 : vector<2x8x8xf32>
    %cst_26 = arith.constant dense<0.000000e+00> : vector<2x8xf32>
    %97 = vector.multi_reduction <add>, %96, %cst_26 [2] : vector<2x8x8xf32> to vector<2x8xf32>
    %98 = vector.shape_cast %97 : vector<2x8xf32> to vector<2x8x1xf32>
    %99 = tpu.reciprocal %98 {approx = true} : vector<2x8x1xf32> -> vector<2x8x1xf32>
    %100 = vector.broadcast %99 : vector<2x8x1xf32> to vector<2x8x8xf32>
    %101 = arith.mulf %96, %100 : vector<2x8x8xf32>
    %102 = arith.truncf %101 : vector<2x8x8xf32> to vector<2x8x8xbf16>
    "tpu.trace_start"() <{level = 10 : i32, message = "bqk,bkd->bqd"}> : () -> ()
    %cst_27 = arith.constant dense<0.000000e+00> : vector<2x8x128xf32>
    %103 = tpu.matmul %102, %88, %cst_27 {dimension_numbers = #tpu.dot_dimension_numbers<[2], [1], [1], [2], [0, 0, 0, 1, 1, 2], [0], [0]>} : vector<2x8x8xbf16>, vector<2x8x128xbf16>, vector<2x8x128xf32> -> vector<2x8x128xf32>
    "tpu.trace_stop"() : () -> ()
    %104 = tpu.concatenate %49, %67, %85, %103 in 2 : vector<2x8x128xf32>, vector<2x8x128xf32>, vector<2x8x128xf32>, vector<2x8x128xf32> -> vector<2x8x512xf32>
    %105 = vector.shape_cast %104 : vector<2x8x512xf32> to vector<16x512xf32>
    %106 = arith.truncf %105 : vector<16x512xf32> to vector<16x512xbf16>
    %c0_28 = arith.constant 0 : index
    %c0_29 = arith.constant 0 : index
    %c0_30 = arith.constant 0 : index
    %107 = vector.load %arg3[%c0_28, %c0_29, %c0_30] : memref<1x512x128xbf16, #tpu.memory_space<vmem>>, vector<1x512x128xbf16>
    %108 = vector.shape_cast %107 : vector<1x512x128xbf16> to vector<512x128xbf16>
    %cst_31 = arith.constant dense<0.000000e+00> : vector<16x128xf32>
    %109 = tpu.matmul %106, %108, %cst_31 {dimension_numbers = #tpu.dot_dimension_numbers<[1], [0], [0], [1], [0, 0, 1, 1], [], []>} : vector<16x512xbf16>, vector<512x128xbf16>, vector<16x128xf32> -> vector<16x128xf32>
    %110 = vector.broadcast %7 : vector<1x128xf32> to vector<16x128xf32>
    %111 = arith.addf %109, %110 : vector<16x128xf32>
    %112 = arith.addf %111, %3 : vector<16x128xf32>
    %cst_32 = arith.constant dense<0.000000e+00> : vector<16xf32>
    %113 = vector.multi_reduction <add>, %112, %cst_32 [1] : vector<16x128xf32> to vector<16xf32>
    %114 = vector.shape_cast %113 : vector<16xf32> to vector<16x1xf32>
    %cst_33 = arith.constant 3.125000e-02 : f32
    %115 = vector.broadcast %cst_33 : f32 to vector<16x1xf32>
    %116 = arith.mulf %114, %115 : vector<16x1xf32>
    %117 = vector.broadcast %116 : vector<16x1xf32> to vector<16x128xf32>
    %118 = arith.subf %112, %117 : vector<16x128xf32>
    %119 = vector.broadcast %18 : vector<1x128xf32> to vector<16x128xf32>
    %120 = arith.mulf %118, %119 : vector<16x128xf32>
    %121 = arith.mulf %120, %120 : vector<16x128xf32>
    %cst_34 = arith.constant dense<0.000000e+00> : vector<16xf32>
    %122 = vector.multi_reduction <add>, %121, %cst_34 [1] : vector<16x128xf32> to vector<16xf32>
    %123 = vector.shape_cast %122 : vector<16xf32> to vector<16x1xf32>
    %cst_35 = arith.constant 3.125000e-02 : f32
    %124 = vector.broadcast %cst_35 : f32 to vector<16x1xf32>
    %125 = arith.mulf %123, %124 : vector<16x1xf32>
    %cst_36 = arith.constant 9.99999974E-6 : f32
    %126 = vector.broadcast %cst_36 : f32 to vector<16x1xf32>
    %127 = arith.addf %125, %126 : vector<16x1xf32>
    %128 = math.rsqrt %127 : vector<16x1xf32>
    %129 = vector.broadcast %128 : vector<16x1xf32> to vector<16x128xf32>
    %130 = arith.mulf %120, %129 : vector<16x128xf32>
    %131 = vector.broadcast %8 : vector<1x128xf32> to vector<16x128xf32>
    %132 = arith.mulf %130, %131 : vector<16x128xf32>
    %133 = vector.broadcast %9 : vector<1x128xf32> to vector<16x128xf32>
    %134 = arith.addf %132, %133 : vector<16x128xf32>
    %135 = arith.truncf %134 : vector<16x128xf32> to vector<16x128xbf16>
    %c0_37 = arith.constant 0 : index
    %c0_38 = arith.constant 0 : index
    %c0_39 = arith.constant 0 : index
    %136 = vector.load %arg4[%c0_37, %c0_38, %c0_39] : memref<1x128x128xbf16, #tpu.memory_space<vmem>>, vector<1x128x128xbf16>
    %137 = vector.shape_cast %136 : vector<1x128x128xbf16> to vector<128x128xbf16>
    %cst_40 = arith.constant dense<0.000000e+00> : vector<16x128xf32>
    %138 = tpu.matmul %135, %137, %cst_40 {dimension_numbers = #tpu.dot_dimension_numbers<[1], [0], [0], [1], [0, 0, 1, 1], [], []>} : vector<16x128xbf16>, vector<128x128xbf16>, vector<16x128xf32> -> vector<16x128xf32>
    %139 = vector.broadcast %10 : vector<1x128xf32> to vector<16x128xf32>
    %140 = arith.addf %138, %139 : vector<16x128xf32>
    %cst_41 = arith.constant 0.000000e+00 : f32
    %141 = vector.broadcast %cst_41 : f32 to vector<16x128xf32>
    %142 = arith.maximumf %140, %141 : vector<16x128xf32>
    %143 = arith.truncf %142 : vector<16x128xf32> to vector<16x128xbf16>
    %c0_42 = arith.constant 0 : index
    %c0_43 = arith.constant 0 : index
    %c0_44 = arith.constant 0 : index
    %144 = vector.load %arg5[%c0_42, %c0_43, %c0_44] : memref<1x128x128xbf16, #tpu.memory_space<vmem>>, vector<1x128x128xbf16>
    %145 = vector.shape_cast %144 : vector<1x128x128xbf16> to vector<128x128xbf16>
    %cst_45 = arith.constant dense<0.000000e+00> : vector<16x128xf32>
    %146 = tpu.matmul %143, %145, %cst_45 {dimension_numbers = #tpu.dot_dimension_numbers<[1], [0], [0], [1], [0, 0, 1, 1], [], []>} : vector<16x128xbf16>, vector<128x128xbf16>, vector<16x128xf32> -> vector<16x128xf32>
    %147 = vector.broadcast %11 : vector<1x128xf32> to vector<16x128xf32>
    %148 = arith.addf %146, %147 : vector<16x128xf32>
    %149 = arith.addf %148, %134 : vector<16x128xf32>
    %cst_46 = arith.constant dense<0.000000e+00> : vector<16xf32>
    %150 = vector.multi_reduction <add>, %149, %cst_46 [1] : vector<16x128xf32> to vector<16xf32>
    %151 = vector.shape_cast %150 : vector<16xf32> to vector<16x1xf32>
    %cst_47 = arith.constant 3.125000e-02 : f32
    %152 = vector.broadcast %cst_47 : f32 to vector<16x1xf32>
    %153 = arith.mulf %151, %152 : vector<16x1xf32>
    %154 = vector.broadcast %153 : vector<16x1xf32> to vector<16x128xf32>
    %155 = arith.subf %149, %154 : vector<16x128xf32>
    %156 = vector.broadcast %18 : vector<1x128xf32> to vector<16x128xf32>
    %157 = arith.mulf %155, %156 : vector<16x128xf32>
    %158 = arith.mulf %157, %157 : vector<16x128xf32>
    %cst_48 = arith.constant dense<0.000000e+00> : vector<16xf32>
    %159 = vector.multi_reduction <add>, %158, %cst_48 [1] : vector<16x128xf32> to vector<16xf32>
    %160 = vector.shape_cast %159 : vector<16xf32> to vector<16x1xf32>
    %cst_49 = arith.constant 3.125000e-02 : f32
    %161 = vector.broadcast %cst_49 : f32 to vector<16x1xf32>
    %162 = arith.mulf %160, %161 : vector<16x1xf32>
    %cst_50 = arith.constant 9.99999974E-6 : f32
    %163 = vector.broadcast %cst_50 : f32 to vector<16x1xf32>
    %164 = arith.addf %162, %163 : vector<16x1xf32>
    %165 = math.rsqrt %164 : vector<16x1xf32>
    %166 = vector.broadcast %165 : vector<16x1xf32> to vector<16x128xf32>
    %167 = arith.mulf %157, %166 : vector<16x128xf32>
    %168 = vector.broadcast %12 : vector<1x128xf32> to vector<16x128xf32>
    %169 = arith.mulf %167, %168 : vector<16x128xf32>
    %170 = vector.broadcast %13 : vector<1x128xf32> to vector<16x128xf32>
    %171 = arith.addf %169, %170 : vector<16x128xf32>
    %c0_51 = arith.constant 0 : index
    %c0_52 = arith.constant 0 : index
    %172 = vector.load %arg7[%c0_51, %c0_52] : memref<16x128xf32, #tpu.memory_space<vmem>>, vector<16x128xf32>
    tpu.vector_store %arg7[%c0_51, %c0_52], %171 {strides = array<i32>} : memref<16x128xf32, #tpu.memory_space<vmem>>, vector<16x128xf32>,
    return
  }
  func.func @transform_1(%arg0: i32) -> (i32, i32, i32) {
    %c0_i32 = arith.constant 0 : i32
    %c0_i32_0 = arith.constant 0 : i32
    %c0_i32_1 = arith.constant 0 : i32
    return %arg0, %c0_i32, %c0_i32_0 : i32, i32, i32
  }
  func.func @transform_2(%arg0: i32) -> (i32, i32, i32) {
    %c0_i32 = arith.constant 0 : i32
    %c0_i32_0 = arith.constant 0 : i32
    %c0_i32_1 = arith.constant 0 : i32
    return %arg0, %c0_i32, %c0_i32_0 : i32, i32, i32
  }
  func.func @transform_3(%arg0: i32) -> (i32, i32, i32) {
    %c0_i32 = arith.constant 0 : i32
    %c0_i32_0 = arith.constant 0 : i32
    %c0_i32_1 = arith.constant 0 : i32
    return %arg0, %c0_i32, %c0_i32_0 : i32, i32, i32
  }
  func.func @transform_4(%arg0: i32) -> (i32, i32, i32) {
    %c0_i32 = arith.constant 0 : i32
    %c0_i32_0 = arith.constant 0 : i32
    %c0_i32_1 = arith.constant 0 : i32
    return %arg0, %c0_i32, %c0_i32_0 : i32, i32, i32
  }
  func.func @transform_5(%arg0: i32) -> (i32, i32, i32) {
    %c0_i32 = arith.constant 0 : i32
    %c0_i32_0 = arith.constant 0 : i32
    %c0_i32_1 = arith.constant 0 : i32
    return %arg0, %c0_i32, %c0_i32_0 : i32, i32, i32
  }
  func.func @transform_6(%arg0: i32) -> (i32, i32) {
    %c0_i32 = arith.constant 0 : i32
    %c0_i32_0 = arith.constant 0 : i32
    %c0_i32_1 = arith.constant 0 : i32
    return %c0_i32, %c0_i32_0 : i32, i32
  }
}

</mosaic_0001>

<bundles_post_ra>
// kernel: tpu_custom_call.1
= control target key start
LH: loop header
LB: loop body
LE: loop exit
PB: predicated region body
PF: predicated region fallthrough
CT: control target
= control target key end

     0   :  { %s4772_s0 = inlined_call_operand.hbm [shape: f32[16,128], index: 0, kind: input, shape index: {}]   ;;  %s4773_s1 = inlined_call_operand.hbm [shape: bf16[2,128,1536], index: 1, kind: input, shape index: {}]   ;;  %s4774_s2 = inlined_call_operand.hbm [shape: bf16[2,512,128], index: 2, kind: input, shape index: {}]   ;;  %s4775_s3 = inlined_call_operand.hbm [shape: bf16[2,128,128], index: 3, kind: input, shape index: {}]   ;;  %s4776_s4 = inlined_call_operand.hbm [shape: bf16[2,128,128], index: 4, kind: input, shape index: {}]   ;;  %s4777_s5 = inlined_call_operand.hbm [shape: f32[2,8,1536], index: 5, kind: input, shape index: {}]   ;;  %s4778_s6 = inlined_call_operand.hbm [shape: f32[16,128], index: 6, kind: output, shape index: {}]  }
   0x1   :  { %4790 = sst [smem:[#allocation25_spill]] %s4774_s2 }
   0x2   :  { %4791 = sst [smem:[#allocation26_spill]] %s4776_s4 }
   0x3   :  { %11 = vsyncpa [#allocation4], 0 }
   0x4   :  { %13 = vsyncpa [#allocation4 + $0x1], 0 }
   0x5   :  { %14 = vsyncpa [#allocation7], 0 }
   0x6   :  { %16 = vsyncpa [#allocation7 + $0x1], 0 }
   0x7   :  { %17 = vsyncpa [#allocation10], 0 }
   0x8   :  { %19 = vsyncpa [#allocation10 + $0x1], 0 }
   0x9   :  { %20 = vsyncpa [#allocation5], 0  ;;  %s4042_s21 = smov 0   ;;  %s4044_s22 = smov 0  }
   0xa   :  { %s4046_s23 = smov 0   ;;  %s4048_s24 = smov 0  }
   0xb LB: > { %4792 = sst [smem:[#allocation22_spill]] %s3986_s23  ;;  %s4061_s25 = sadd.s32 4294967295, %s3990_s24   ;;  %s3990_s24 = sphi %s4048_s24, %s4813_s24   ;;  %s3986_s23 = sphi %s4046_s23, %s4815_s23   ;;  %s3982_s22 = sphi %s4044_s22, %s4817_s22   ;;  %s3978_s21 = sphi %s4042_s21, %s4816_s21  }
   0xc   : > { %s4064_s26 = sadd.s32 1, %s3990_s24   ;;  %s33_s28 = sadd.s32 1, %s3986_s23 }
   0xd   : > { %4793 = sst [smem:[#allocation23_spill]] %s4064_s26  ;;  %s30_s27 = ssub.s32 %s3990_s24, %s4064_s26 }
   0xe   : > { %p31_p0 = scmp.eq.s32.totalorder %s30_s27, 0  ;;  %p40_p1 = scmp.ne.s32.totalorder %s3986_s23, %s3982_s22 }
   0xf   : > { %p41_p2 = scmp.eq.s32.totalorder %s3990_s24, 0  ;;  %p46_p3 = scmp.ne.s32.totalorder %s3982_s22, %s3978_s21 }
  0x10   : > { %s4074_s29 = scalar_select %p31_p0, %s3986_s23, %s33_s28  }
  0x11   : > { %p42_p4 = por %p41_p2, %p40_p1  ;;  %p4779_p5 = scmp.eq.s32.totalorder %s4061_s25, 0 }
  0x12   : > { %4794 = sst [smem:[#allocation24_spill]] %s4074_s29  ;;  %p3457_p6 = scmp.lt.s32.totalorder %s3990_s24, 2 }
  0x13   : > { %p4080_p7 = por %p4779_p5, %p46_p3  ;;  %s4085_s7 = sand.u32 1, %s3986_s23  }
  0x14   : > { %p4087_p8 = pnand %p3457_p6, %p42_p4  ;;  %s4781_s9 = sand.u32 1, %s3990_s24  }
  0x15   : > { %s4795_s30 = scalar_select %p4080_p7, 1, 0 }
  0x16   : > { %s4796_s8 = scalar_select %p4087_p8, 1, 0 }
  0x17   : > { %s2988_s10 = sshll.u32 %s4085_s7, 8  ;;  %s3173_s11 = sshll.u32 %s3990_s24, 12 }
  0x18   : > { %s220_s12 = scalar_lea.vmem [#allocation6], %s2988_s10  ;;  %s4797_s2 = sld [smem:[#allocation25_spill]] }
  0x19   : > { %s227_s13 = sshll.u32 %s220_s12, 4  ;;  %s4103_s17 = scalar_lea.sflag [#allocation7], %s4781_s9  ;;  %s4099_s13 = int_to_ptr.vmem [resolvable:$true] %s227_s13 }
  0x1a   : > { %p4109_p10 = pneg %p4087_p8 }
  0x1e   : > { %s4097_s16 = scalar_lea.hbm %s4797_s2, %s3173_s11  ;;  %s3743_s27 = scalar_lea.hbm %s4797_s2, 8192 }
  0x1f   : > { %s3738_s18 = scalar_lea.hbm %s4097_s16, 4096  ;;  %p3744_p13 = scmp.lt.u32.totalorder %s4097_s16, %s4797_s2 }
  0x20   : > { %p3739_p9 = scmp.ne.s32.totalorder %s4097_s16, %s3738_s18  ;;  %p3745_p0 = scmp.lt.u32.totalorder %s3743_s27, %s3738_s18 }
  0x21   : > { %p3747_p2 = scmp.lt.u32.totalorder %s3738_s18, %s4097_s16 }
  0x22   : > { %p3741_p11 = pnand %p4109_p10, %p3739_p9  ;;  %p3746_p1 = por %p3745_p0, %p3744_p13 }
  0x24   : > { %p3742_p12 = pneg %p3741_p11  ;;  %p3748_p3 = por %p3747_p2, %p3746_p1 }
  0x26   : > { %p3749_p4 = pnand %p3748_p3, %p3742_p12 }
  0x28   : > { %3752 = shalt.err (!%p3749_p4)
}
  0x29   : > { %s3753_s11 = scalar_lea.vmem %s4099_s13, 4096  ;;  %s3992_s12 = smov [#allocation6]  }
  0x2a   : > { %p3754_p6 = scmp.ne.s32.totalorder %s4099_s13, %s3753_s11  ;;  %s3758_s14 = sshll.u32 %s3992_s12, 4  ;;  %s3759_s14 = int_to_ptr.vmem [resolvable:$false] %s3758_s14 }
  0x2b   : > { %s3760_s15 = scalar_lea.vmem %s3759_s14, 8192  ;;  %p3761_p5 = scmp.lt.s32.totalorder %s4099_s13, %s3759_s14 }
  0x2c   : > { %p3756_p9 = pnand %p3754_p6, %p4109_p10  ;;  %p3762_p7 = scmp.lt.s32.totalorder %s3760_s15, %s3753_s11 }
  0x2e   : > { %p3757_p11 = pneg %p3756_p9  ;;  %p3763_p13 = por %p3762_p7, %p3761_p5 }
  0x30   : > { %p3764_p0 = pnand %p3763_p13, %p3757_p11 }
  0x32   : > { %3767 = shalt.err (!%p3764_p0)
}
  0x33   : > { %s4782_s18 = smov 64   ;;  %s4784_s20 = smov 4  }
  0x34   : > { %3447 = dma.hbm_to_vmem [thread:$0]  (!%p4087_p8), %s4097_s16, 4096, %s4099_s13, %s4103_s17, %s4782_s18, %s4782_s18, %s4784_s20  }
  0x35   : > { %p2998_p5 = scmp.ge.s32.totalorder %s3990_s24, 1  ;;  %p296_p7 = scmp.lt.s32.totalorder %s3990_s24, 3 }
  0x36   : > { %s2991_s21 = sshll.u32 %s4085_s7, 6  ;;  %s3174_s27 = sshll.u32 %s3990_s24, 10 }
  0x37   : > { %p4140_p12 = pnand %p2998_p5, %p296_p7  ;;  %s4147_s12 = scalar_lea.hbm %s4775_s3, %s3174_s27 }
  0x38   : > { %s241_s14 = scalar_lea.vmem [#allocation8], %s2991_s21  ;;  %s4800_s4 = sld [smem:[#allocation26_spill]] }
  0x39   : > { %s4799_s28 = scalar_select %p4140_p12, 1, 0 }
  0x3a   : > { %s248_s15 = sshll.u32 %s241_s14, 4  ;;  %s262_s18 = scalar_lea.vmem [#allocation9], %s2991_s21  ;;  %s4149_s15 = int_to_ptr.vmem [resolvable:$true] %s248_s15 }
  0x3b   : > { %s269_s20 = sshll.u32 %s262_s18, 4  ;;  %s3418_s10 = smul.u32 768, %s4085_s7  ;;  %s4156_s20 = int_to_ptr.vmem [resolvable:$true] %s269_s20 }
  0x3c   : > { %s4801_s11 = sand.u32 1, %s3990_s24  }
  0x3d   : > { %s4161_s2 = scalar_lea.sflag [#allocation10], %s4801_s11 }
  0x3e   : > { %s4154_s16 = scalar_lea.hbm %s4800_s4, %s3174_s27  ;;  %s3773_s13 = scalar_lea.hbm %s4800_s4, 2048 }
  0x3f   : > { %s3768_s14 = scalar_lea.hbm %s4154_s16, 1024  ;;  %p3774_p4 = scmp.lt.u32.totalorder %s4154_s16, %s4800_s4 }
  0x40   : > { %p3769_p1 = scmp.ne.s32.totalorder %s4154_s16, %s3768_s14  ;;  %p3775_p6 = scmp.lt.u32.totalorder %s3773_s13, %s3768_s14 }
  0x41   : > { %p3777_p11 = scmp.lt.u32.totalorder %s3768_s14, %s4154_s16 }
  0x42   : > { %p3771_p2 = pnand %p3769_p1, %p4109_p10  ;;  %p3776_p9 = por %p3775_p6, %p3774_p4 }
  0x44   : > { %p3772_p3 = pneg %p3771_p2  ;;  %p3778_p13 = por %p3777_p11, %p3776_p9 }
  0x46   : > { %p3779_p0 = pnand %p3778_p13, %p3772_p3 }
  0x48   : > { %3782 = shalt.err (!%p3779_p0)
}
  0x49   : > { %s3783_s18 = scalar_lea.vmem %s4156_s20, 1024  ;;  %s3995_s21 = smov [#allocation9]  }
  0x4a   : > { %p3784_p5 = scmp.ne.s32.totalorder %s4156_s20, %s3783_s18  ;;  %s3788_s11 = sshll.u32 %s3995_s21, 4  ;;  %s3789_s11 = int_to_ptr.vmem [resolvable:$false] %s3788_s11 }
  0x4b   : > { %s3790_s23 = scalar_lea.vmem %s3789_s11, 2048  ;;  %p3791_p2 = scmp.lt.s32.totalorder %s4156_s20, %s3789_s11 }
  0x4c   : > { %p3786_p7 = pnand %p3784_p5, %p4109_p10  ;;  %p3792_p12 = scmp.lt.s32.totalorder %s3790_s23, %s3783_s18 }
  0x4e   : > { %p3787_p1 = pneg %p3786_p7  ;;  %p3793_p4 = por %p3792_p12, %p3791_p2 }
  0x50   : > { %p3794_p6 = pnand %p3793_p4, %p3787_p1 }
  0x52   : > { %3797 = shalt.err (!%p3794_p6)
}
  0x53   : > { %s4802_s29 = smov 4   ;;  %s4803_s14 = smov 64  }
  0x54   : > { %3453 = dma.hbm_to_vmem [thread:$0]  (!%p4087_p8), %s4154_s16, 1024, %s4156_s20, %s4161_s2, %s4803_s14, %s4803_s14, %s4802_s29  }
  0x55   : > { %s3419_s9 = smul.u32 12288, %s3990_s24  ;;  %s199_s27 = scalar_lea.vmem [#allocation3], %s3418_s10 }
  0x56   : > { %s206_s13 = sshll.u32 %s199_s27, 4  ;;  %s3420_s23 = smul.u32 96, %s4085_s7  ;;  %s4196_s13 = int_to_ptr.vmem [resolvable:$true] %s206_s13 }
  0x57   : > { %s4194_s11 = scalar_lea.hbm %s4773_s1, %s3419_s9  ;;  %s196_s4 = scalar_lea.sflag [#allocation4], %s4085_s7 }
  0x58   : > { %s3798_s26 = scalar_lea.hbm %s4194_s11, 12288  ;;  %s3803_s10 = scalar_lea.hbm %s4773_s1, 24576 }
  0x59   : > { %p3799_p12 = scmp.ne.s32.totalorder %s4194_s11, %s3798_s26  ;;  %p3804_p11 = scmp.lt.u32.totalorder %s4194_s11, %s4773_s1 }
  0x5a   : > { %p3805_p13 = scmp.lt.u32.totalorder %s3803_s10, %s3798_s26  ;;  %p3807_p5 = scmp.lt.u32.totalorder %s3798_s26, %s4194_s11 }
  0x5b   : > { %p3801_p3 = pnand %p3799_p12, %p4109_p10 }
  0x5c   : > { %p3806_p0 = por %p3805_p13, %p3804_p11 }
  0x5d   : > { %p3802_p9 = pneg %p3801_p3 }
  0x5e   : > { %p3808_p7 = por %p3807_p5, %p3806_p0 }
  0x60   : > { %p3809_p1 = pnand %p3808_p7, %p3802_p9 }
  0x62   : > { %3812 = shalt.err (!%p3809_p1)
}
  0x63   : > { %s3813_s18 = scalar_lea.vmem %s4196_s13, 12288  ;;  %s3996_s21 = smov [#allocation3]  }
  0x64   : > { %p3814_p2 = scmp.ne.s32.totalorder %s4196_s13, %s3813_s18  ;;  %s3818_s20 = sshll.u32 %s3996_s21, 4  ;;  %s3819_s20 = int_to_ptr.vmem [resolvable:$false] %s3818_s20 }
  0x65   : > { %s3820_s16 = scalar_lea.vmem %s3819_s20, 24576  ;;  %p3821_p12 = scmp.lt.s32.totalorder %s4196_s13, %s3819_s20 }
  0x66   : > { %p3816_p4 = pnand %p3814_p2, %p4109_p10  ;;  %p3822_p3 = scmp.lt.s32.totalorder %s3820_s16, %s3813_s18 }
  0x68   : > { %p3817_p6 = pneg %p3816_p4  ;;  %p3823_p11 = por %p3822_p3, %p3821_p12 }
  0x6a   : > { %p3824_p13 = pnand %p3823_p11, %p3817_p6 }
  0x6c   : > { %3827 = shalt.err (!%p3824_p13)
}
  0x6d   : > { %s3997_s26 = smov 768   ;;  %s3998_s10 = smov 48  }
  0x6e   : > { %3444 = dma.hbm_to_vmem [thread:$0]  (!%p4087_p8), %s4194_s11, 12288, %s4196_s13, %s196_s4, %s3997_s26, %s3997_s26, %s3998_s10  }
  0x6f   : > { %s3828_s27 = scalar_lea.hbm %s4147_s12, 1024  ;;  %s3833_s21 = scalar_lea.hbm %s4775_s3, 2048 }
  0x70   : > { %p3829_p9 = scmp.ne.s32.totalorder %s4147_s12, %s3828_s27  ;;  %p3834_p7 = scmp.lt.u32.totalorder %s4147_s12, %s4775_s3 }
  0x71   : > { %p3835_p1 = scmp.lt.u32.totalorder %s3833_s21, %s3828_s27  ;;  %p3837_p4 = scmp.lt.u32.totalorder %s3828_s27, %s4147_s12 }
  0x72   : > { %p3831_p0 = pnand %p3829_p9, %p4109_p10 }
  0x73   : > { %p3836_p2 = por %p3835_p1, %p3834_p7 }
  0x74   : > { %p3832_p5 = pneg %p3831_p0 }
  0x75   : > { %p3838_p6 = por %p3837_p4, %p3836_p2 }
  0x77   : > { %p3839_p12 = pnand %p3838_p6, %p3832_p5 }
  0x79   : > { %3842 = shalt.err (!%p3839_p12)
}
  0x7a   : > { %s3843_s4 = scalar_lea.vmem %s4149_s15, 1024  ;;  %s3999_s13 = smov [#allocation8]  }
  0x7b   : > { %p3844_p3 = scmp.ne.s32.totalorder %s4149_s15, %s3843_s4  ;;  %s3848_s11 = sshll.u32 %s3999_s13, 4  ;;  %s3849_s11 = int_to_ptr.vmem [resolvable:$false] %s3848_s11 }
  0x7c   : > { %s3850_s26 = scalar_lea.vmem %s3849_s11, 2048  ;;  %p3851_p9 = scmp.lt.s32.totalorder %s4149_s15, %s3849_s11 }
  0x7d   : > { %p3846_p11 = pnand %p3844_p3, %p4109_p10  ;;  %p3852_p0 = scmp.lt.s32.totalorder %s3850_s26, %s3843_s4 }
  0x7f   : > { %p3847_p13 = pneg %p3846_p11  ;;  %p3853_p7 = por %p3852_p0, %p3851_p9 }
  0x81   : > { %p3854_p1 = pnand %p3853_p7, %p3847_p13 }
  0x83   : > { %3857 = shalt.err (!%p3854_p1)
}
  0x84   : > { %3450 = dma.hbm_to_vmem [thread:$0]  (!%p4087_p8), %s4147_s12, 1024, %s4149_s15, %s4103_s17, %s4803_s14, %s4803_s14, %s4802_s29  }
  0x85   : > { %s3421_s10 = smul.u32 1536, %s3990_s24  ;;  %s283_s27 = scalar_lea.vmem [#allocation11], %s3420_s23 }
  0x86   : > { %s291_s9 = sshll.u32 %s283_s27, 4  ;;  %s3863_s11 = scalar_lea.hbm %s4777_s5, 3072  ;;  %s292_s9 = int_to_ptr.vmem [resolvable:$true] %s291_s9 }
  0x87   : > { %s289_s20 = scalar_lea.hbm %s4777_s5, %s3421_s10 }
  0x88   : > { %s3858_s16 = scalar_lea.hbm %s289_s20, 1536  ;;  %p3864_p6 = scmp.lt.u32.totalorder %s289_s20, %s4777_s5 }
  0x89   : > { %p3859_p5 = scmp.ne.s32.totalorder %s289_s20, %s3858_s16  ;;  %p3865_p12 = scmp.lt.u32.totalorder %s3863_s11, %s3858_s16 }
  0x8a   : > { %p3867_p11 = scmp.lt.u32.totalorder %s3858_s16, %s289_s20 }
  0x8b   : > { %p3861_p2 = pnand %p3859_p5, %p4109_p10  ;;  %p3866_p3 = por %p3865_p12, %p3864_p6 }
  0x8d   : > { %p3862_p4 = pneg %p3861_p2  ;;  %p3868_p13 = por %p3867_p11, %p3866_p3 }
  0x8f   : > { %p3869_p9 = pnand %p3868_p13, %p3862_p4 }
  0x91   : > { %3872 = shalt.err (!%p3869_p9)
}
  0x92   : > { %s3873_s24 = scalar_lea.vmem %s292_s9, 1536  ;;  %s4000_s7 = smov [#allocation11]  }
  0x93   : > { %p3874_p0 = scmp.ne.s32.totalorder %s292_s9, %s3873_s24  ;;  %s3878_s12 = sshll.u32 %s4000_s7, 4  ;;  %s3879_s12 = int_to_ptr.vmem [resolvable:$false] %s3878_s12 }
  0x94   : > { %s3880_s15 = scalar_lea.vmem %s3879_s12, 3072  ;;  %p3881_p5 = scmp.lt.s32.totalorder %s292_s9, %s3879_s12 }
  0x95   : > { %p3876_p7 = pnand %p3874_p0, %p4109_p10  ;;  %p3882_p2 = scmp.lt.s32.totalorder %s3880_s15, %s3873_s24 }
  0x97   : > { %p3877_p1 = pneg %p3876_p7  ;;  %p3883_p8 = por %p3882_p2, %p3881_p5 }
  0x99   : > { %p3884_p6 = pnand %p3883_p8, %p3877_p1 }
  0x9b   : > { %3887 = shalt.err (!%p3884_p6)
}
  0x9c   : > { %p4804_p12 = scmp.ne.s32.totalorder %s4796_s8, 0  ;;  %p4805_p4 = scmp.ne.s32.totalorder %s4799_s28, 0 }
  0x9d   : > { %s4270_s19 = sand.u32 (!%p4805_p4), 1, %s3982_s22   ;;  %p4806_p10 = scmp.ne.s32.totalorder (!%p4805_p4), %s4795_s30, 0 }
  0x9e   : > { %3456 = dma.hbm_to_vmem [thread:$0]  (!%p4804_p12), %s289_s20, 1536, %s292_s9, %s4161_s2  }
  0x9f   : > { %300 = sbr.rel (%p4805_p4) target bundleno = 4154 (0x103a), region = 40  ;;  %s303_s14 = scalar_lea.sflag (!%p4805_p4), [#allocation4], %s4270_s19 }
  0xa0   : > { %s3422_s29 = smul.u32 (!%p4805_p4), 768, %s4270_s19 }
  0xa2   : > { %s4274_s23 = scalar_lea.vmem (!%p4805_p4), [#allocation3], %s3422_s29 }
  0xa6   : > { %3957 = dma.done.wait (%p4806_p10), %s303_s14, 12288  }
  0xa7   : > { %3959 = vsyncadd (%p4806_p10), %s303_s14, 4294955008  ;;  %s311_s2 = sand.u32 1, %s4061_s25   ;;  %s2999_s8 = sshll.u32 %s4270_s19, 8 }
  0xa8   : > { %s312_s28 = scalar_lea.sflag [#allocation7], %s311_s2  ;;  %s4282_s10 = scalar_lea.vmem [#allocation6], %s2999_s8 }
  0xa9   : > { %3961 = dma.done.wait (%p4806_p10), %s312_s28, 5120  }
  0xaa   : > { %3963 = vsyncadd (%p4806_p10), %s312_s28, 4294962176  ;;  %s3000_s27 = sshll.u32 %s4270_s19, 6  ;;  %s330_s18 = scalar_lea.sflag [#allocation10], %s311_s2 }
  0xab   : > { %s4289_s9 = scalar_lea.vmem [#allocation8], %s3000_s27  ;;  %s4291_s21 = scalar_lea.vmem [#allocation9], %s3000_s27 }
  0xac   : > { %3965 = dma.done.wait (%p4806_p10), %s330_s18, 2560  }
  0xad   : > { %3967 = vsyncadd (%p4806_p10), %s330_s18, 4294964736  ;;  %s3423_s20 = smul.u32 96, %s4270_s19  ;;  %s4001_s16 = smov [#allocation12]  }
  0xae   : > { %s396_s4 = sshll.u32 %s4001_s16, 4  ;;  %s3888_s26 = scalar_lea.hbm %s4772_s0, 256  ;;  %s4298_s4 = int_to_ptr.vmem [resolvable:$true] %s396_s4 }
  0xaf   : > { %p3889_p8 = scmp.ne.s32.totalorder %s4772_s0, %s3888_s26  ;;  %p4807_p3 = scmp.eq.s32.totalorder %s4061_s25, 0 }
  0xb0   : > { %p3894_p9 = scmp.lt.u32.totalorder %s3888_s26, %s4772_s0 }
  0xb1   : > { %p3890_p11 = pnand %p3889_p8, %p4807_p3 }
  0xb3   : > { %p3891_p13 = pneg %p3890_p11 }
  0xb5   : > { %p3896_p0 = pnand %p3894_p9, %p3891_p13 }
  0xb7   : > { %3899 = shalt.err (!%p3896_p0)  }
  0xb8   : > { %s4312_s12 = scalar_lea.vmem %s4298_s4, 256  ;;  %p4808_p1 = pmov %p4807_p3 }
  0xb9   : > { %p3901_p7 = scmp.ne.s32.totalorder %s4298_s4, %s4312_s12  ;;  %p3907_p6 = scmp.lt.s32.totalorder %s4298_s4, %s4298_s4 }
  0xba   : > { %p3908_p12 = scmp.lt.s32.totalorder %s4312_s12, %s4312_s12 }
  0xbb   : > { %p3902_p5 = pnand %p3901_p7, %p4808_p1 }
  0xbc   : > { %p4325_p4 = por %p3908_p12, %p3907_p6 }
  0xbd   : > { %p3903_p2 = pneg %p3902_p5 }
  0xbf   : > { %p3910_p10 = pnand %p4325_p4, %p3903_p2 }
  0xc1   : > { %3913 = shalt.err (!%p3910_p10)  }
  0xc2   : > { %p4810_p8 = pmov %p4808_p1  ;;  %s4337_s14 = scalar_lea.vmem [#allocation11], %s3423_s20 }
  0xc3   : > { %p4811_p3 = pmov %p4808_p1 }
  0xc4   : > { %3435 = dma.hbm_to_vmem [thread:$0]  (%p4810_p8), %s4772_s0, 256, %s4298_s4, [#allocation2] }
  0xc5   : > { %3969 = dma.done.wait (%p4811_p3), [#allocation2], 256  ;;  %p4812_p11 = pmov %p4808_p1 }
  0xc6   : > { %v4002_v0 = vmov 0   ;;  %v3503_v1 = vld [vmem:[%s4274_s23 + $0x4] ss:$48 sps:$4 sm:$0xff]   ;;  %v3505_v2 = vld [vmem:[%s4274_s23] ss:$48 sps:$4 sm:$0xff]   ;;  %v404_v23 = vld [vmem:[#allocation12 + $0x8] sm:$0xff] }
  0xc7   : > { %3971 = vsyncadd (%p4812_p11), [#allocation2], 4294967040  ;;  %1079 = vmatprep.mubr.bf16.mxu0 %v4002_v0  ;;  %1122 = vmatprep.mubr.bf16.mxu1 %v4002_v0  ;;  %v3506_v3 = vld [vmem:[%s4274_s23 + $0x64] ss:$48 sps:$4 sm:$0xff]   ;;  %v3508_v4 = vld [vmem:[%s4274_s23 + $0x60] ss:$48 sps:$4 sm:$0xff]  }
  0xc8   : > { %1047 = vmatprep.subr.bf16.mxu0 %v3503_v1  ;;  %v3509_v5 = vld [vmem:[%s4274_s23 + $0xc4] ss:$48 sps:$4 sm:$0xff]   ;;  %v3511_v6 = vld [vmem:[%s4274_s23 + $0xc0] ss:$48 sps:$4 sm:$0xff]   ;;  %v3551_v15 = vld [vmem:[%s4274_s23 + $0xc] ss:$48 sps:$4 sm:$0xff]  }
  0xc9   : > { %1048 = vmatpush1.bf16.msra.mxu0 %v3505_v2  ;;  %v3512_v7 = vld [vmem:[%s4274_s23 + $0x124] ss:$48 sps:$4 sm:$0xff]   ;;  %v3514_v8 = vld [vmem:[%s4274_s23 + $0x120] ss:$48 sps:$4 sm:$0xff]   ;;  %v3553_v16 = vld [vmem:[%s4274_s23 + $0x8] ss:$48 sps:$4 sm:$0xff]   ;;  %1090 = vmatprep.subr.bf16.mxu1 %v3551_v15 }
  0xca   : > { %1049 = vmatprep.subr.bf16.mxu0 %v3506_v3  ;;  %v3515_v9 = vld [vmem:[%s4274_s23 + $0x184] ss:$48 sps:$4 sm:$0xff]   ;;  %v3517_v10 = vld [vmem:[%s4274_s23 + $0x180] ss:$48 sps:$4 sm:$0xff]   ;;  %v3554_v18 = vld [vmem:[%s4274_s23 + $0x6c] ss:$48 sps:$4 sm:$0xff]   ;;  %1091 = vmatpush1.bf16.msra.mxu1 %v3553_v16 }
  0xcb   : > { %v3518_v11 = vld [vmem:[%s4274_s23 + $0x1e4] ss:$48 sps:$4 sm:$0xff]   ;;  %v3520_v12 = vld [vmem:[%s4274_s23 + $0x1e0] ss:$48 sps:$4 sm:$0xff]   ;;  %v3556_v21 = vld [vmem:[%s4274_s23 + $0x68] ss:$48 sps:$4 sm:$0xff]   ;;  %1092 = vmatprep.subr.bf16.mxu1 %v3554_v18 }
  0xcc   : > { %v3521_v13 = vld [vmem:[%s4274_s23 + $0x244] ss:$48 sps:$4 sm:$0xff]   ;;  %v3523_v14 = vld [vmem:[%s4274_s23 + $0x240] ss:$48 sps:$4 sm:$0xff]   ;;  %v3557_v22 = vld [vmem:[%s4274_s23 + $0xcc] ss:$48 sps:$4 sm:$0xff]  }
  0xcd   : > { %1050 = vmatpush1.bf16.msra.mxu0 %v3508_v4  ;;  %v3524_v17 = vld [vmem:[%s4274_s23 + $0x2a4] ss:$48 sps:$4 sm:$0xff]   ;;  %v3526_v19 = vld [vmem:[%s4274_s23 + $0x2a0] ss:$48 sps:$4 sm:$0xff]   ;;  %v3559_v25 = vld [vmem:[%s4274_s23 + $0xc8] ss:$48 sps:$4 sm:$0xff]  }
  0xce   : > { %1051 = vmatprep.subr.bf16.mxu0 %v3509_v5  ;;  %v403_v20 = vld [vmem:[#allocation12] sm:$0xff]  ;;  %1093 = vmatpush1.bf16.msra.mxu1 %v3556_v21  ;;  %v3560_v27 = vld [vmem:[%s4274_s23 + $0x12c] ss:$48 sps:$4 sm:$0xff]   ;;  %v3562_v30 = vld [vmem:[%s4274_s23 + $0x128] ss:$48 sps:$4 sm:$0xff]   ;;  %vm4004_vm0 = vmmov 0  }
  0xcf   : > { %v3529_v24 = vld [vmem:[%s4274_s23 + $0x14] ss:$48 sps:$4 sm:$0xff]   ;;  %v4368_v26 = vpack.c.bf16 %v404_v23, %v403_v20  ;;  %1094 = vmatprep.subr.bf16.mxu1 %v3557_v22  ;;  %v3527_v28 = vld [vmem:[%s4274_s23 + $0x10] ss:$48 sps:$4 sm:$0xff]   ;;  %v3563_v31 = vld [vmem:[%s4274_s23 + $0x18c] ss:$48 sps:$4 sm:$0xff]  }
  0xd0   : > { %v3532_v29 = vld [vmem:[%s4274_s23 + $0x74] ss:$48 sps:$4 sm:$0xff]   ;;  %v3530_v32 = vld [vmem:[%s4274_s23 + $0x70] ss:$48 sps:$4 sm:$0xff]   ;;  %v3565_v34 = vld [vmem:[%s4274_s23 + $0x188] ss:$48 sps:$4 sm:$0xff]  }
  0xd1   : > { %1052 = vmatpush1.bf16.msra.mxu0 %v3511_v6  ;;  %v3535_v33 = vld [vmem:[%s4274_s23 + $0xd4] ss:$48 sps:$4 sm:$0xff]   ;;  %v3566_v35 = vld [vmem:[%s4274_s23 + $0x1ec] ss:$48 sps:$4 sm:$0xff]   ;;  %v3533_v36 = vld [vmem:[%s4274_s23 + $0xd0] ss:$48 sps:$4 sm:$0xff]  }
  0xd2   : > { %1053 = vmatprep.subr.bf16.mxu0 %v3512_v7  ;;  %1095 = vmatpush1.bf16.msra.mxu1 %v3559_v25  ;;  %v3538_v37 = vld [vmem:[%s4274_s23 + $0x134] ss:$48 sps:$4 sm:$0xff]   ;;  %v3536_v38 = vld [vmem:[%s4274_s23 + $0x130] ss:$48 sps:$4 sm:$0xff]   ;;  %v3568_v39 = vld [vmem:[%s4274_s23 + $0x1e8] ss:$48 sps:$4 sm:$0xff]  }
  0xd3   : > { %1096 = vmatprep.subr.bf16.mxu1 %v3560_v27  ;;  %v3569_v40 = vld [vmem:[%s4274_s23 + $0x24c] ss:$48 sps:$4 sm:$0xff]   ;;  %v3541_v41 = vld [vmem:[%s4274_s23 + $0x194] ss:$48 sps:$4 sm:$0xff]   ;;  %v3571_v42 = vld [vmem:[%s4274_s23 + $0x248] ss:$48 sps:$4 sm:$0xff]  }
  0xd4   : > { %v3572_v43 = vld [vmem:[%s4274_s23 + $0x2ac] ss:$48 sps:$4 sm:$0xff]   ;;  %v3539_v44 = vld [vmem:[%s4274_s23 + $0x190] ss:$48 sps:$4 sm:$0xff]   ;;  %v3544_v45 = vld [vmem:[%s4274_s23 + $0x1f4] ss:$48 sps:$4 sm:$0xff]  }
  0xd5   : > { %1054 = vmatpush1.bf16.msra.mxu0 %v3514_v8  ;;  %v3574_v46 = vld [vmem:[%s4274_s23 + $0x2a8] ss:$48 sps:$4 sm:$0xff]   ;;  %v3577_v47 = vld [vmem:[%s4274_s23 + $0x1c] ss:$48 sps:$4 sm:$0xff]   ;;  %v3542_v48 = vld [vmem:[%s4274_s23 + $0x1f0] ss:$48 sps:$4 sm:$0xff]  }
  0xd6   : > { %1055 = vmatprep.subr.bf16.mxu0 %v3515_v9  ;;  %1097 = vmatpush1.bf16.msra.mxu1 %v3562_v30  ;;  %v3547_v49 = vld [vmem:[%s4274_s23 + $0x254] ss:$48 sps:$4 sm:$0xff]   ;;  %v3575_v50 = vld [vmem:[%s4274_s23 + $0x18] ss:$48 sps:$4 sm:$0xff]   ;;  %v3580_v51 = vld [vmem:[%s4274_s23 + $0x7c] ss:$48 sps:$4 sm:$0xff]  }
  0xd7   : > { %1098 = vmatprep.subr.bf16.mxu1 %v3563_v31  ;;  %v3545_v52 = vld [vmem:[%s4274_s23 + $0x250] ss:$48 sps:$4 sm:$0xff]   ;;  %v3550_v53 = vld [vmem:[%s4274_s23 + $0x2b4] ss:$48 sps:$4 sm:$0xff]   ;;  %v3578_v54 = vld [vmem:[%s4274_s23 + $0x78] ss:$48 sps:$4 sm:$0xff]  }
  0xd8   : > { %v3583_v55 = vld [vmem:[%s4274_s23 + $0xdc] ss:$48 sps:$4 sm:$0xff]   ;;  %v3548_v56 = vld [vmem:[%s4274_s23 + $0x2b0] ss:$48 sps:$4 sm:$0xff]   ;;  %v3581_v57 = vld [vmem:[%s4274_s23 + $0xd8] ss:$48 sps:$4 sm:$0xff]  }
  0xd9   : > { %1056 = vmatpush1.bf16.msra.mxu0 %v3517_v10  ;;  %v3586_v58 = vld [vmem:[%s4274_s23 + $0x13c] ss:$48 sps:$4 sm:$0xff]   ;;  %v3584_v59 = vld [vmem:[%s4274_s23 + $0x138] ss:$48 sps:$4 sm:$0xff]   ;;  %v3601_v5 = vld [vmem:[%s4274_s23 + $0x24] ss:$48 sps:$4 sm:$0xff]  }
  0xda   : > { %1057 = vmatprep.subr.bf16.mxu0 %v3518_v11  ;;  %1099 = vmatpush1.bf16.msra.mxu1 %v3565_v34  ;;  %v3589_v60 = vld [vmem:[%s4274_s23 + $0x19c] ss:$48 sps:$4 sm:$0xff]   ;;  %v3587_v61 = vld [vmem:[%s4274_s23 + $0x198] ss:$48 sps:$4 sm:$0xff]   ;;  %v3599_v6 = vld [vmem:[%s4274_s23 + $0x20] ss:$48 sps:$4 sm:$0xff]  }
  0xdb   : > { %1100 = vmatprep.subr.bf16.mxu1 %v3566_v35  ;;  %v3592_v62 = vld [vmem:[%s4274_s23 + $0x1fc] ss:$48 sps:$4 sm:$0xff]   ;;  %v3590_v63 = vld [vmem:[%s4274_s23 + $0x1f8] ss:$48 sps:$4 sm:$0xff]   ;;  %v3607_v9 = vld [vmem:[%s4274_s23 + $0x84] ss:$48 sps:$4 sm:$0xff]  }
  0xdc   : > { %v3595_v1 = vld [vmem:[%s4274_s23 + $0x25c] ss:$48 sps:$4 sm:$0xff]   ;;  %v3593_v2 = vld [vmem:[%s4274_s23 + $0x258] ss:$48 sps:$4 sm:$0xff]   ;;  %v3605_v10 = vld [vmem:[%s4274_s23 + $0x80] ss:$48 sps:$4 sm:$0xff]  }
  0xdd   : > { %1058 = vmatpush1.bf16.msra.mxu0 %v3520_v12  ;;  %v3598_v3 = vld [vmem:[%s4274_s23 + $0x2bc] ss:$48 sps:$4 sm:$0xff]   ;;  %v3596_v4 = vld [vmem:[%s4274_s23 + $0x2b8] ss:$48 sps:$4 sm:$0xff]   ;;  %v3613_v12 = vld [vmem:[%s4274_s23 + $0xe4] ss:$48 sps:$4 sm:$0xff]  }
  0xde   : > { %1059 = vmatprep.subr.bf16.mxu0 %v3521_v13  ;;  %1101 = vmatpush1.bf16.msra.mxu1 %v3568_v39  ;;  %v3604_v7 = vld [vmem:[%s4274_s23 + $0x2c] ss:$48 sps:$4 sm:$0xff]   ;;  %v3602_v8 = vld [vmem:[%s4274_s23 + $0x28] ss:$48 sps:$4 sm:$0xff]   ;;  %v3611_v13 = vld [vmem:[%s4274_s23 + $0xe0] ss:$48 sps:$4 sm:$0xff]  }
  0xdf   : > { %1102 = vmatprep.subr.bf16.mxu1 %v3569_v40  ;;  %v3608_v11 = vld [vmem:[%s4274_s23 + $0x88] ss:$48 sps:$4 sm:$0xff]   ;;  %v3616_v15 = vld [vmem:[%s4274_s23 + $0xec] ss:$48 sps:$4 sm:$0xff]   ;;  %v3617_v16 = vld [vmem:[%s4274_s23 + $0x140] ss:$48 sps:$4 sm:$0xff]  }
  0xe0   : > { %v3622_v18 = vld [vmem:[%s4274_s23 + $0x14c] ss:$48 sps:$4 sm:$0xff]   ;;  %v3620_v20 = vld [vmem:[%s4274_s23 + $0x148] ss:$48 sps:$4 sm:$0xff]   ;;  %v3623_v22 = vld [vmem:[%s4274_s23 + $0x1a0] ss:$48 sps:$4 sm:$0xff]  }
  0xe1   : > { %1060 = vmatpush1.bf16.msra.mxu0 %v3523_v14  ;;  %v3614_v14 = vld [vmem:[%s4274_s23 + $0xe8] ss:$48 sps:$4 sm:$0xff]   ;;  %v3628_v21 = vld [vmem:[%s4274_s23 + $0x1ac] ss:$48 sps:$4 sm:$0xff]   ;;  %v3631_v23 = vld [vmem:[%s4274_s23 + $0x204] ss:$48 sps:$4 sm:$0xff]  }
  0xe2   : > { %1061 = vmatprep.subr.bf16.mxu0 %v3524_v17  ;;  %1103 = vmatpush1.bf16.msra.mxu1 %v3571_v42  ;;  %v3619_v17 = vld [vmem:[%s4274_s23 + $0x144] ss:$48 sps:$4 sm:$0xff]   ;;  %v3634_v25 = vld [vmem:[%s4274_s23 + $0x20c] ss:$48 sps:$4 sm:$0xff]   ;;  %v3629_v27 = vld [vmem:[%s4274_s23 + $0x200] ss:$48 sps:$4 sm:$0xff]  }
  0xe3   : > { %1104 = vmatprep.subr.bf16.mxu1 %v3572_v43  ;;  %v3640_v30 = vld [vmem:[%s4274_s23 + $0x26c] ss:$48 sps:$4 sm:$0xff]   ;;  %v3635_v31 = vld [vmem:[%s4274_s23 + $0x260] ss:$48 sps:$4 sm:$0xff]   ;;  %vm1483_vm1 = vcmask 1043456   ;;  %vm1455_vm2 = vcmask 64512  }
  0xe4   : > { %v3646_v34 = vld [vmem:[%s4274_s23 + $0x2cc] ss:$48 sps:$4 sm:$0xff]   ;;  %v3641_v35 = vld [vmem:[%s4274_s23 + $0x2c0] ss:$48 sps:$4 sm:$0xff]   ;;  %p3459_p13 = scmp.eq.s32.totalorder %s4061_s25, 1 }
  0xe5   : > { %1062 = vmatpush1.bf16.msra.mxu0 %v3526_v19  ;;  %v3625_v19 = vld [vmem:[%s4274_s23 + $0x1a4] ss:$48 sps:$4 sm:$0xff]  }
  0xe6   : > { %1133 = vmatprep.subr.bf16.mxu0 %v3529_v24  ;;  %1105 = vmatpush1.bf16.msra.mxu1 %v3574_v46  ;;  %v3626_v24 = vld [vmem:[%s4274_s23 + $0x1a8] ss:$48 sps:$4 sm:$0xff]   ;;  %p3916_p9 = pnand %p3901_p7, %p3459_p13 }
  0xe7   : > { %1176 = vmatprep.subr.bf16.mxu1 %v3577_v47 }
  0xe8   : > { %1080 = vmatmul.mubr.bf16.vlgmr.msra.gmra.mrb[0].mxu0 %v4368_v26  ;;  %p3917_p0 = pneg %p3916_p9 }
  0xe9   : > { %1134 = vmatpush1.bf16.msra.mxu0 %v3527_v28  ;;  %1165 = vmatprep.mubr.bf16.mxu0 %v4002_v0  ;;  %v3637_v28 = vld [vmem:[%s4274_s23 + $0x264] ss:$48 sps:$4 sm:$0xff]  }
  0xea   : > { %1135 = vmatprep.subr.bf16.mxu0 %v3532_v29  ;;  %1123 = vmatmul.mubr.bf16.vlgmr.msra.gmra.mrb[0].mxu1 %v4368_v26  ;;  %v3632_v29 = vld [vmem:[%s4274_s23 + $0x208] ss:$48 sps:$4 sm:$0xff]   ;;  %p3924_p1 = pnand %p3917_p0, %p4325_p4 }
  0xeb   : > { %1177 = vmatpush1.bf16.msra.mxu1 %v3575_v50  ;;  %1208 = vmatprep.mubr.bf16.mxu1 %v4002_v0 }
  0xec   : > { %1178 = vmatprep.subr.bf16.mxu1 %v3580_v51 }
  0xed   : > { %1136 = vmatpush1.bf16.msra.mxu0 %v3530_v32  ;;  %v3643_v32 = vld [vmem:[%s4274_s23 + $0x2c4] ss:$48 sps:$4 sm:$0xff]  }
  0xee   : > { %1137 = vmatprep.subr.bf16.mxu0 %v3535_v33  ;;  %v3638_v33 = vld [vmem:[%s4274_s23 + $0x268] ss:$48 sps:$4 sm:$0xff]  }
  0xef   : > { %1179 = vmatpush1.bf16.msra.mxu1 %v3578_v54  ;;  %v407_v54 = vld [vmem:[%s4337_s14 + $0x10] sm:$0xff] }
  0xf0   : > { %1180 = vmatprep.subr.bf16.mxu1 %v3583_v55  ;;  %v408_v55 = vld [vmem:[%s4337_s14 + $0x18] sm:$0xff] }
  0xf1   : > { %1138 = vmatpush1.bf16.msra.mxu0 %v3533_v36  ;;  %v3644_v36 = vld [vmem:[%s4274_s23 + $0x2c8] ss:$48 sps:$4 sm:$0xff]  }
  0xf2   : > { %1139 = vmatprep.subr.bf16.mxu0 %v3538_v37  ;;  %v4003_v37 = vmov 0.0  }
  0xf3   : > { %1181 = vmatpush1.bf16.msra.mxu1 %v3581_v57 }
  0xf4   : > { %1182 = vmatprep.subr.bf16.mxu1 %v3586_v58 }
  0xf5   : > { %1140 = vmatpush1.bf16.msra.mxu0 %v3536_v38  ;;  %v417_v38 = vlaneseq }
  0xf6   : > { %1141 = vmatprep.subr.bf16.mxu0 %v3541_v41  ;;  %v406_v41 = vld [vmem:[%s4337_s14 + $0x8] sm:$0xff] }
  0xf7   : > { %1183 = vmatpush1.bf16.msra.mxu1 %v3584_v59  ;;  %v4460_v39 = vshrl.u32 %v417_v38, 7 }
  0xf8   : > { %1184 = vmatprep.subr.bf16.mxu1 %v3589_v60 }
  0xf9   : > { %1142 = vmatpush1.bf16.msra.mxu0 %v3539_v44  ;;  %v4463_v40 = vsub.s32 0, %v4460_v39 }
  0xfa   : > { %1143 = vmatprep.subr.bf16.mxu0 %v3544_v45 }
  0xfb   : > { %1185 = vmatpush1.bf16.msra.mxu1 %v3587_v61  ;;  %v526_v43 = vrot.slane %v406_v41, %v4463_v40  ;;  %v534_v57 = vrot.slane %v408_v55, %v4463_v40  ;;  %v416_v41 = vld [vmem:[%s4337_s14 + $0x58] sm:$0xff] }
  0xfc   : > { %1186 = vmatprep.subr.bf16.mxu1 %v3592_v62 }
  0xfd   : > { %1144 = vmatpush1.bf16.msra.mxu0 %v3542_v48 }
  0xfe   : > { %1145 = vmatprep.subr.bf16.mxu0 %v3547_v49 }
  0xff   : > { %1187 = vmatpush1.bf16.msra.mxu1 %v3590_v63 }
 0x100   : > { %1188 = vmatprep.subr.bf16.mxu1 %v3595_v1 }
 0x101   : > { %1146 = vmatpush1.bf16.msra.mxu0 %v3545_v52 }
 0x102   : > { %1147 = vmatprep.subr.bf16.mxu0 %v3550_v53 }
 0x103   : > { %1189 = vmatpush1.bf16.msra.mxu1 %v3593_v2  ;;  %v409_v2 = vld [vmem:[%s4337_s14 + $0x20] sm:$0xff] }
 0x104   : > { %1190 = vmatprep.subr.bf16.mxu1 %v3598_v3 }
 0x105   : > { %1148 = vmatpush1.bf16.msra.mxu0 %v3548_v56  ;;  %v530_v56 = vrot.slane %v407_v54, %v4463_v40 }
 0x106   : > { %1219 = vmatprep.subr.bf16.mxu0 %v3601_v5  ;;  %v410_v5 = vld [vmem:[%s4337_s14 + $0x28] sm:$0xff] }
 0x107   : > { %1191 = vmatpush1.bf16.msra.mxu1 %v3596_v4 }
 0x108   : > { %1166 = vmatmul.mubr.bf16.vlgmr.msra.gmra.mrb[4].mxu0 %v4368_v26  ;;  %1262 = vmatprep.subr.bf16.mxu1 %v3604_v7  ;;  %v538_v7 = vrot.slane %v409_v2, %v4463_v40 }
 0x109   : > { %1251 = vmatprep.mubr.bf16.mxu0 %v4002_v0  ;;  %1220 = vmatpush1.bf16.msra.mxu0 %v3599_v6 }
 0x10a   : > { %1209 = vmatmul.mubr.bf16.vlgmr.msra.gmra.mrb[4].mxu1 %v4368_v26  ;;  %1221 = vmatprep.subr.bf16.mxu0 %v3607_v9 }
 0x10b   : > { %1294 = vmatprep.mubr.bf16.mxu1 %v4002_v0  ;;  %1263 = vmatpush1.bf16.msra.mxu1 %v3602_v8  ;;  %v3610_v0 = vld [vmem:[%s4274_s23 + $0x8c] ss:$48 sps:$4 sm:$0xff]   ;;  %v542_v8 = vrot.slane %v410_v5, %v4463_v40 }
 0x10c   : > { %1264 = vmatprep.subr.bf16.mxu1 %v3610_v0 }
 0x10d   : > { %1222 = vmatpush1.bf16.msra.mxu0 %v3605_v10 }
 0x10e   : > { %1223 = vmatprep.subr.bf16.mxu0 %v3613_v12 }
 0x10f   : > { %1265 = vmatpush1.bf16.msra.mxu1 %v3608_v11 }
 0x110   : > { %1266 = vmatprep.subr.bf16.mxu1 %v3616_v15 }
 0x111   : > { %1224 = vmatpush1.bf16.msra.mxu0 %v3611_v13 }
 0x112   : > { %1225 = vmatprep.subr.bf16.mxu0 %v3619_v17 }
 0x113   : > { %1267 = vmatpush1.bf16.msra.mxu1 %v3614_v14 }
 0x114   : > { %1268 = vmatprep.subr.bf16.mxu1 %v3622_v18  ;;  %v411_v18 = vld [vmem:[%s4337_s14 + $0x30] sm:$0xff] }
 0x115   : > { %1226 = vmatpush1.bf16.msra.mxu0 %v3617_v16 }
 0x116   : > { %1227 = vmatprep.subr.bf16.mxu0 %v3625_v19  ;;  %v412_v19 = vld [vmem:[%s4337_s14 + $0x38] sm:$0xff] }
 0x117   : > { %1269 = vmatpush1.bf16.msra.mxu1 %v3620_v20  ;;  %v546_v20 = vrot.slane %v411_v18, %v4463_v40 }
 0x118   : > { %1270 = vmatprep.subr.bf16.mxu1 %v3628_v21  ;;  %v550_v21 = vrot.slane %v412_v19, %v4463_v40 }
 0x119   : > { %1228 = vmatpush1.bf16.msra.mxu0 %v3623_v22 }
 0x11a   : > { %1229 = vmatprep.subr.bf16.mxu0 %v3631_v23 }
 0x11b   : > { %1271 = vmatpush1.bf16.msra.mxu1 %v3626_v24 }
 0x11c   : > { %1272 = vmatprep.subr.bf16.mxu1 %v3634_v25 }
 0x11d   : > { %1230 = vmatpush1.bf16.msra.mxu0 %v3629_v27 }
 0x11e   : > { %1231 = vmatprep.subr.bf16.mxu0 %v3637_v28 }
 0x11f   : > { %1273 = vmatpush1.bf16.msra.mxu1 %v3632_v29 }
 0x120   : > { %1274 = vmatprep.subr.bf16.mxu1 %v3640_v30 }
 0x121   : > { %1232 = vmatpush1.bf16.msra.mxu0 %v3635_v31 }
 0x122   : > { %1233 = vmatprep.subr.bf16.mxu0 %v3643_v32 }
 0x123   : > { %1275 = vmatpush1.bf16.msra.mxu1 %v3638_v33  ;;  %v413_v33 = vld [vmem:[%s4337_s14 + $0x40] sm:$0xff] }
 0x124   : > { %1276 = vmatprep.subr.bf16.mxu1 %v3646_v34  ;;  %v414_v34 = vld [vmem:[%s4337_s14 + $0x48] sm:$0xff] }
 0x125   : > { %1234 = vmatpush1.bf16.msra.mxu0 %v3641_v35  ;;  %v415_v35 = vld [vmem:[%s4337_s14 + $0x50] sm:$0xff] }
 0x126   : > { %3282 = vmatprep.subr.bf16.mxu0 %v4003_v37 }
 0x127   : > { %1277 = vmatpush1.bf16.msra.mxu1 %v3644_v36  ;;  %v554_v36 = vrot.slane %v413_v33, %v4463_v40 }
 0x128   : > { %1252 = vmatmul.mubr.bf16.vlgmr.msra.gmra.mrb[8].mxu0 %v4368_v26  ;;  %3288 = vmatprep.subr.bf16.mxu1 %v4003_v37 }
 0x129   : > { %3284 = vmatprep.mubr.msk.bf16.mxu0 %vm4004_vm0, %v4003_v37 }
 0x12a   : > { %1295 = vmatmul.mubr.bf16.vlgmr.msra.gmra.mrb[8].mxu1 %v4368_v26  ;;  %v4466_v26 = vld [vmem:[%s4337_s14] sm:$0xff] }
 0x12b   : > { %3290 = vmatprep.mubr.msk.bf16.mxu1 %vm4004_vm0, %v4003_v37  ;;  %v522_v42 = vrot.slane %v4466_v26, %v4463_v40 }
 0x1bb   : > { %v1081_v44 = vpop.f32.mrb[0].mxu0 }
 0x1bc   : > { %v1082_v45 = vadd.f32 %v1081_v44, %v522_v42  ;;  %v1083_v46 = vpop.f32.mrb[1].mxu0 }
 0x1bd   : > { %v1084_v47 = vadd.f32 %v1083_v46, %v526_v43  ;;  %v1085_v48 = vpop.f32.mrb[2].mxu0  ;;  %v1124_v58 = vpop.f32.mrb[0].mxu1 }
 0x1be   : > { %v1086_v49 = vadd.f32 %v1085_v48, %v522_v42  ;;  %v1087_v50 = vpop.f32.mrb[3].mxu0  ;;  %v1125_v59 = vadd.f32 %v1124_v58, %v530_v56  ;;  %v1126_v60 = vpop.f32.mrb[1].mxu1  ;;  %v558_v42 = vrot.slane %v414_v34, %v4463_v40 }
 0x1bf   : > { %v4472_v51 = vpack.c.bf16 %v1084_v47, %v1082_v45  ;;  %v1088_v52 = vadd.f32 %v1087_v50, %v526_v43  ;;  %v1127_v61 = vadd.f32 %v1126_v60, %v534_v57  ;;  %v1128_v62 = vpop.f32.mrb[2].mxu1  ;;  %v562_v43 = vrot.slane %v415_v35, %v4463_v40 }
 0x1c0   : > { %v1129_v63 = vadd.f32 %v1128_v62, %v530_v56  ;;  %v1130_v1 = vpop.f32.mrb[3].mxu1  ;;  %v566_v45 = vrot.slane %v416_v41, %v4463_v40 }
 0x1c1   : > { %v4474_v53 = vpack.c.bf16 %v1088_v52, %v1086_v49  ;;  %v4481_v3 = vpack.c.bf16 %v1127_v61, %v1125_v59  ;;  %v1131_v4 = vadd.f32 %v1130_v1, %v534_v57 }
 0x1c3   : > { %v4484_v6 = vpack.c.bf16 %v1131_v4, %v1129_v63 }
 0x1db   : > { %v1167_v9 = vpop.f32.mrb[4].mxu0 }
 0x1dc   : > { %v1168_v10 = vadd.f32 %v1167_v9, %v538_v7  ;;  %v1169_v0 = vpop.f32.mrb[5].mxu0 }
 0x1dd   : > { %v1170_v11 = vadd.f32 %v1169_v0, %v542_v8  ;;  %v1171_v12 = vpop.f32.mrb[6].mxu0  ;;  %v1210_v22 = vpop.f32.mrb[4].mxu1 }
 0x1de   : > { %v1172_v13 = vadd.f32 %v1171_v12, %v538_v7  ;;  %v1173_v14 = vpop.f32.mrb[7].mxu0  ;;  %v1211_v23 = vadd.f32 %v1210_v22, %v546_v20  ;;  %v1212_v24 = vpop.f32.mrb[5].mxu1 }
 0x1df   : > { %v4488_v15 = vpack.c.bf16 %v1170_v11, %v1168_v10  ;;  %v1174_v16 = vadd.f32 %v1173_v14, %v542_v8  ;;  %v1213_v25 = vadd.f32 %v1212_v24, %v550_v21  ;;  %v1214_v27 = vpop.f32.mrb[6].mxu1 }
 0x1e0   : > { %v1215_v28 = vadd.f32 %v1214_v27, %v546_v20  ;;  %v1216_v29 = vpop.f32.mrb[7].mxu1 }
 0x1e1   : > { %v4490_v17 = vpack.c.bf16 %v1174_v16, %v1172_v13  ;;  %3283 = vmatpush3.bf16.xpose.msra.mxu0 %v4488_v15  ;;  %v4506_v30 = vpack.c.bf16 %v1213_v25, %v1211_v23  ;;  %v1217_v31 = vadd.f32 %v1216_v29, %v550_v21 }
 0x1e2   : > { %3294 = vmatprep.subr.bf16.mxu0 %v4003_v37 }
 0x1e3   : > { %3289 = vmatpush3.bf16.xpose.msra.mxu1 %v4490_v17  ;;  %v4508_v32 = vpack.c.bf16 %v1217_v31, %v1215_v28 }
 0x1e4   : > { %3300 = vmatprep.subr.bf16.mxu1 %v4003_v37 }
 0x1e8   : > { %3285 = vmatmul.mubr.bf16.vlgmr.msra.gmra.mrb[12].mxu0 %v4472_v51 }
 0x1e9   : > { %3296 = vmatprep.mubr.msk.bf16.mxu0 %vm4004_vm0, %v4003_v37 }
 0x1ea   : > { %3291 = vmatmul.mubr.bf16.vlgmr.msra.gmra.mrb[12].mxu1 %v4474_v53 }
 0x1eb   : > { %3302 = vmatprep.mubr.msk.bf16.mxu1 %vm4004_vm0, %v4003_v37 }
 0x1fb   : > { %v1253_v44 = vpop.f32.mrb[8].mxu0 }
 0x1fc   : > { %v1254_v46 = vadd.f32 %v1253_v44, %v554_v36  ;;  %v1255_v47 = vpop.f32.mrb[9].mxu0 }
 0x1fd   : > { %v1256_v48 = vadd.f32 %v1255_v47, %v558_v42  ;;  %v1257_v49 = vpop.f32.mrb[10].mxu0  ;;  %v1296_v50 = vpop.f32.mrb[8].mxu1 }
 0x1fe   : > { %v1258_v52 = vadd.f32 %v1257_v49, %v554_v36  ;;  %v1259_v54 = vpop.f32.mrb[11].mxu0  ;;  %v1297_v55 = vadd.f32 %v1296_v50, %v562_v43  ;;  %v1298_v56 = vpop.f32.mrb[9].mxu1 }
 0x1ff   : > { %v3184_v57 = vpack.c.bf16 %v1256_v48, %v1254_v46  ;;  %v1260_v58 = vadd.f32 %v1259_v54, %v558_v42  ;;  %v1299_v59 = vadd.f32 %v1298_v56, %v566_v45  ;;  %v1300_v60 = vpop.f32.mrb[10].mxu1 }
 0x200   : > { %v1301_v61 = vadd.f32 %v1300_v60, %v562_v43  ;;  %v1302_v62 = vpop.f32.mrb[11].mxu1 }
 0x201   : > { %v3186_v63 = vpack.c.bf16 %v1260_v58, %v1258_v52  ;;  %v3185_v1 = vpack.c.bf16 %v1299_v59, %v1297_v55  ;;  %v1303_v2 = vadd.f32 %v1302_v62, %v566_v45  ;;  %v1485_v40 = vsel %vm1483_vm1, %v3184_v57, 0 }
 0x202   : > { %3295 = vmatpush3.bf16.msra.mxu0 %v1485_v40  ;;  %v1687_v7 = vrot.slane %v3184_v57, 4  ;;  %v1575_v55 = vrot.slane %v4488_v15, 4  ;;  %v1619_v58 = vrot.slane %v4490_v17, 4  ;;  %v1573_v15 = vrot.slane %v4472_v51, 4 }
 0x203   : > { %v3187_v4 = vpack.c.bf16 %v1303_v2, %v1301_v61  ;;  %v1531_v5 = vsel %vm1483_vm1, %v3186_v63, 0  ;;  %v1734_v8 = vrot.slane %v3186_v63, 4  ;;  %3306 = vmatprep.subr.bf16.mxu0 %v4003_v37  ;;  %v2093_v9 = vrot.slane %v3185_v1, 4 }
 0x204   : > { %3301 = vmatpush3.bf16.msra.mxu1 %v1531_v5  ;;  %v1692_v0 = vsel %vm1483_vm1, %v1687_v7, 0  ;;  %v4525_v12 = vsel %vm1483_vm1, %v3185_v1, 0  ;;  %v1617_v59 = vrot.slane %v4474_v53, 4 }
 0x205   : > { %3312 = vmatprep.subr.bf16.mxu1 %v4003_v37  ;;  %v2140_v10 = vrot.slane %v3187_v4, 4  ;;  %v1739_v11 = vsel %vm1483_vm1, %v1734_v8, 0  ;;  %v4528_v13 = vsel %vm1483_vm1, %v3187_v4, 0  ;;  %v4531_v14 = vsel %vm1483_vm1, %v2093_v9, 0 }
 0x207   : > { %v4534_v16 = vsel %vm1483_vm1, %v2140_v10, 0 }
 0x2bb   : > { %v1407_v18 = vpop.f32.mrb[12].mxu0 }
 0x2bc   : > { %v1453_v19 = vmul.f32 0.35355338, %v1407_v18  ;;  %v3286_v20 = vpop.f32.mrb[13].mxu0 }
 0x2bd   : > { %v1410_v21 = vpop.f32.mrb[14].mxu0  ;;  %v1447_v22 = vpop.f32.mrb[12].mxu1 }
 0x2be   : > { %v1454_v23 = vmul.f32 0.35355338, %v1447_v22  ;;  %v3287_v24 = vpop.f32.mrb[15].mxu0  ;;  %v3292_v25 = vpop.f32.mrb[13].mxu1  ;;  %v1456_v27 = vsel %vm1455_vm2, %v1453_v19, -inf }
 0x2bf   : > { %v1450_v28 = vpop.f32.mrb[14].mxu1  ;;  %1457 = vmax.xlane.f32.xlu0 %v1456_v27 }
 0x2c0   : > { %v3293_v29 = vpop.f32.mrb[15].mxu1  ;;  %v1459_v31 = vsel %vm1455_vm2, %v1454_v23, -inf }
 0x2c3   : > { %1460 = vmax.xlane.f32.xlu0 %v1459_v31 }
 0x34c   : > { %v1458_v33 = vpop.xlane.xlu0 %1457 }
 0x34d   : > { %v1462_v34 = vsub.f32 %v1453_v19, %v1458_v33 }
 0x34f   : > { %v1464_v35 = vmul.f32 1.442695, %v1462_v34 }
 0x350   : > { %v1461_v36 = vpop.xlane.xlu0 %1460 }
 0x351   : > { %3695 = vpow2.f32 %v1464_v35  ;;  %v1463_v41 = vsub.f32 %v1454_v23, %v1461_v36 }
 0x353   : > { %v1466_v42 = vmul.f32 1.442695, %v1463_v41 }
 0x355   : > { %3697 = vpow2.f32 %v1466_v42 }
 0x35b   : > { %v3696_v43 = vpop.eup %3695 }
 0x35c   : > { %v1468_v44 = vsel %vm1455_vm2, %v3696_v43, 0.0 }
 0x35d   : > { %1469 = vadd.xlane.f32.xlu1 %v1468_v44 }
 0x35f   : > { %v3698_v45 = vpop.eup %3697 }
 0x360   : > { %v1471_v46 = vsel %vm1455_vm2, %v3698_v45, 0.0 }
 0x361   : > { %1472 = vadd.xlane.f32.xlu1 %v1471_v46 }
 0x3ea   : > { %v1470_v47 = vpop.xlane.xlu1 %1469 }
 0x3eb   : > { %3699 = vrcp.f32 %v1470_v47 }
 0x3ee   : > { %v1473_v48 = vpop.xlane.xlu1 %1472 }
 0x3ef   : > { %3701 = vrcp.f32 %v1473_v48 }
 0x3f5   : > { %v3700_v49 = vpop.eup %3699 }
 0x3f6   : > { %v1476_v50 = vmul.f32 %v3700_v49, %v3696_v43 }
 0x3f8   : > { %v1478_v52 = vpack.c.bf16 %v1476_v50, %v1476_v50 }
 0x3f9   : > { %v3702_v54 = vpop.eup %3701 }
 0x3fa   : > { %v1477_v56 = vmul.f32 %v3702_v54, %v3698_v45  ;;  %3297 = vmatmul.mubr.msk.bf16.vlgmr.msra.gmra.mrb[16].mxu0 %vm1455_vm2, %v1478_v52 }
 0x3fb   : > { %3307 = vmatpush3.bf16.xpose.msra.mxu0 %v1575_v55  ;;  %3308 = vmatprep.mubr.msk.bf16.mxu0 %vm4004_vm0, %v4003_v37 }
 0x3fc   : > { %v1479_v57 = vpack.c.bf16 %v1477_v56, %v1477_v56  ;;  %3318 = vmatprep.subr.bf16.mxu0 %v4003_v37 }
 0x3fe   : > { %3303 = vmatmul.mubr.msk.bf16.vlgmr.msra.gmra.mrb[16].mxu1 %vm1455_vm2, %v1479_v57 }
 0x3ff   : > { %3313 = vmatpush3.bf16.xpose.msra.mxu1 %v1619_v58  ;;  %3314 = vmatprep.mubr.msk.bf16.mxu1 %vm4004_vm0, %v4003_v37 }
 0x400   : > { %3324 = vmatprep.subr.bf16.mxu1 %v4003_v37 }
 0x402   : > { %3309 = vmatmul.mubr.bf16.vlgmr.msra.gmra.mrb[20].mxu0 %v1573_v15 }
 0x403   : > { %3319 = vmatpush3.bf16.msra.mxu0 %v1692_v0  ;;  %3320 = vmatprep.mubr.msk.bf16.mxu0 %vm4004_vm0, %v4003_v37 }
 0x404   : > { %3330 = vmatprep.subr.bf16.mxu0 %v4003_v37 }
 0x406   : > { %3315 = vmatmul.mubr.bf16.vlgmr.msra.gmra.mrb[20].mxu1 %v1617_v59 }
 0x407   : > { %3325 = vmatpush3.bf16.msra.mxu1 %v1739_v11  ;;  %3326 = vmatprep.mubr.msk.bf16.mxu1 %vm4004_vm0, %v4003_v37 }
 0x408   : > { %3336 = vmatprep.subr.bf16.mxu1 %v4003_v37 }
 0x4cd   : > { %v4558_v17 = vpop.f32.mrb[16].mxu0 }
 0x4ce   : > { %v3298_v51 = vpop.f32.mrb[17].mxu0 }
 0x4cf   : > { %v1524_v60 = vpop.f32.mrb[18].mxu0 }
 0x4d0   : > { %v3299_v61 = vpop.f32.mrb[19].mxu0 }
 0x4d1   : > { %v4560_v62 = vpop.f32.mrb[16].mxu1 }
 0x4d2   : > { %v2187_v63 = vpack.c.bf16 %v4560_v62, %v4558_v17  ;;  %v3304_v53 = vpop.f32.mrb[17].mxu1 }
 0x4d3   : > { %v1570_v1 = vpop.f32.mrb[18].mxu1 }
 0x4d4   : > { %v3305_v2 = vpop.f32.mrb[19].mxu1 }
 0x4d5   : > { %v1611_v40 = vpop.f32.mrb[20].mxu0 }
 0x4d6   : > { %v1661_v4 = vmul.f32 0.35355338, %v1611_v40  ;;  %v3310_v5 = vpop.f32.mrb[21].mxu0 }
 0x4d7   : > { %v1614_v7 = vpop.f32.mrb[22].mxu0 }
 0x4d8   : > { %v3311_v8 = vpop.f32.mrb[23].mxu0  ;;  %v1663_v9 = vsel %vm1455_vm2, %v1661_v4, -inf }
 0x4d9   : > { %v1655_v10 = vpop.f32.mrb[20].mxu1  ;;  %1664 = vmax.xlane.f32.xlu0 %v1663_v9 }
 0x4da   : > { %v1662_v0 = vmul.f32 0.35355338, %v1655_v10  ;;  %v3316_v11 = vpop.f32.mrb[21].mxu1 }
 0x4db   : > { %v1658_v18 = vpop.f32.mrb[22].mxu1 }
 0x4dc   : > { %v3317_v19 = vpop.f32.mrb[23].mxu1  ;;  %v1666_v20 = vsel %vm1455_vm2, %v1662_v0, -inf }
 0x4dd   : > { %1667 = vmax.xlane.f32.xlu1 %v1666_v20 }
 0x566   : > { %v1665_v21 = vpop.xlane.xlu0 %1664 }
 0x567   : > { %v1669_v22 = vsub.f32 %v1661_v4, %v1665_v21 }
 0x569   : > { %v1671_v23 = vmul.f32 1.442695, %v1669_v22 }
 0x56a   : > { %v1668_v24 = vpop.xlane.xlu1 %1667 }
 0x56b   : > { %3703 = vpow2.f32 %v1671_v23  ;;  %v1670_v25 = vsub.f32 %v1662_v0, %v1668_v24 }
 0x56d   : > { %v1673_v27 = vmul.f32 1.442695, %v1670_v25  ;;  %v1981_v25 = vrot.slane %v4506_v30, 4 }
 0x56f   : > { %3705 = vpow2.f32 %v1673_v27 }
 0x575   : > { %v3704_v28 = vpop.eup %3703 }
 0x576   : > { %v1675_v29 = vsel %vm1455_vm2, %v3704_v28, 0.0 }
 0x577   : > { %1676 = vadd.xlane.f32.xlu0 %v1675_v29  ;;  %v2025_v29 = vrot.slane %v4508_v32, 4 }
 0x579   : > { %v3706_v31 = vpop.eup %3705 }
 0x57a   : > { %v1678_v33 = vsel %vm1455_vm2, %v3706_v31, 0.0 }
 0x57b   : > { %1679 = vadd.xlane.f32.xlu1 %v1678_v33 }
 0x604   : > { %v1677_v34 = vpop.xlane.xlu0 %1676 }
 0x605   : > { %3707 = vrcp.f32 %v1677_v34 }
 0x608   : > { %v1680_v35 = vpop.xlane.xlu1 %1679 }
 0x609   : > { %3709 = vrcp.f32 %v1680_v35 }
 0x60f   : > { %v3708_v36 = vpop.eup %3707 }
 0x610   : > { %v1683_v41 = vmul.f32 %v3708_v36, %v3704_v28 }
 0x612   : > { %v1685_v42 = vpack.c.bf16 %v1683_v41, %v1683_v41 }
 0x613   : > { %v3710_v43 = vpop.eup %3709 }
 0x614   : > { %v1684_v44 = vmul.f32 %v3710_v43, %v3706_v31  ;;  %3321 = vmatmul.mubr.msk.bf16.vlgmr.msra.gmra.mrb[24].mxu0 %vm1455_vm2, %v1685_v42  ;;  %v2023_v31 = vrot.slane %v4484_v6, 4 }
 0x615   : > { %3331 = vmatpush3.bf16.xpose.msra.mxu0 %v4506_v30  ;;  %3332 = vmatprep.mubr.msk.bf16.mxu0 %vm4004_vm0, %v4003_v37  ;;  %v1979_v30 = vrot.slane %v4481_v3, 4 }
 0x616   : > { %v1686_v45 = vpack.c.bf16 %v1684_v44, %v1684_v44  ;;  %3342 = vmatprep.subr.bf16.mxu0 %v4003_v37 }
 0x618   : > { %3327 = vmatmul.mubr.msk.bf16.vlgmr.msra.gmra.mrb[24].mxu1 %vm1455_vm2, %v1686_v45 }
 0x619   : > { %3337 = vmatpush3.bf16.xpose.msra.mxu1 %v4508_v32  ;;  %3338 = vmatprep.mubr.msk.bf16.mxu1 %vm4004_vm0, %v4003_v37 }
 0x61a   : > { %3348 = vmatprep.subr.bf16.mxu1 %v4003_v37 }
 0x61c   : > { %3333 = vmatmul.mubr.bf16.vlgmr.msra.gmra.mrb[28].mxu0 %v4481_v3 }
 0x61d   : > { %3343 = vmatpush3.bf16.msra.mxu0 %v4525_v12  ;;  %3344 = vmatprep.mubr.msk.bf16.mxu0 %vm4004_vm0, %v4003_v37 }
 0x61e   : > { %3354 = vmatprep.subr.bf16.mxu0 %v4003_v37 }
 0x620   : > { %3339 = vmatmul.mubr.bf16.vlgmr.msra.gmra.mrb[28].mxu1 %v4484_v6 }
 0x621   : > { %3349 = vmatpush3.bf16.msra.mxu1 %v4528_v13  ;;  %3350 = vmatprep.mubr.msk.bf16.mxu1 %vm4004_vm0, %v4003_v37 }
 0x622   : > { %3360 = vmatprep.subr.bf16.mxu1 %v4003_v37 }
 0x6e7   : > { %v4588_v46 = vpop.f32.mrb[24].mxu0 }
 0x6e8   : > { %v3322_v47 = vpop.f32.mrb[25].mxu0 }
 0x6e9   : > { %v1731_v48 = vpop.f32.mrb[26].mxu0 }
 0x6ea   : > { %v3323_v49 = vpop.f32.mrb[27].mxu0 }
 0x6eb   : > { %v4590_v12 = vpop.f32.mrb[24].mxu1 }
 0x6ec   : > { %v2188_v50 = vpack.c.bf16 %v4590_v12, %v4588_v46  ;;  %v3328_v52 = vpop.f32.mrb[25].mxu1  ;;  %v3653_v46 = vld [vmem:[%s4282_s10 + $0x58] sm:$0xff]   ;;  %v3667_v12 = vld [vmem:[%s4282_s10 + $0xd0] sm:$0xff]  }
 0x6ed   : > { %v1778_v54 = vpop.f32.mrb[26].mxu1 }
 0x6ee   : > { %v3329_v55 = vpop.f32.mrb[27].mxu1 }
 0x6ef   : > { %v1815_v56 = vpop.f32.mrb[28].mxu0 }
 0x6f0   : > { %v1861_v13 = vmul.f32 0.35355338, %v1815_v56  ;;  %v3334_v57 = vpop.f32.mrb[29].mxu0 }
 0x6f1   : > { %v1818_v58 = vpop.f32.mrb[30].mxu0 }
 0x6f2   : > { %v3335_v15 = vpop.f32.mrb[31].mxu0  ;;  %v1863_v59 = vsel %vm1455_vm2, %v1861_v13, -inf }
 0x6f3   : > { %v1855_v51 = vpop.f32.mrb[28].mxu1  ;;  %1864 = vmax.xlane.f32.xlu0 %v1863_v59 }
 0x6f4   : > { %v1862_v60 = vmul.f32 0.35355338, %v1855_v51  ;;  %v3340_v61 = vpop.f32.mrb[29].mxu1 }
 0x6f5   : > { %v1858_v53 = vpop.f32.mrb[30].mxu1 }
 0x6f6   : > { %v3341_v1 = vpop.f32.mrb[31].mxu1  ;;  %v1866_v2 = vsel %vm1455_vm2, %v1862_v60, -inf }
 0x6f7   : > { %1867 = vmax.xlane.f32.xlu1 %v1866_v2  ;;  %v3647_v2 = vld [vmem:[%s4282_s10 + $0x40] sm:$0xff]  }
 0x780   : > { %v1865_v40 = vpop.xlane.xlu0 %1864 }
 0x781   : > { %v1869_v4 = vsub.f32 %v1861_v13, %v1865_v40  ;;  %v3663_v40 = vld [vmem:[%s4282_s10 + $0xc0] sm:$0xff]  }
 0x783   : > { %v1871_v5 = vmul.f32 1.442695, %v1869_v4 }
 0x784   : > { %v1868_v7 = vpop.xlane.xlu1 %1867 }
 0x785   : > { %3711 = vpow2.f32 %v1871_v5  ;;  %v1870_v8 = vsub.f32 %v1862_v60, %v1868_v7 }
 0x787   : > { %v1873_v9 = vmul.f32 1.442695, %v1870_v8 }
 0x789   : > { %3713 = vpow2.f32 %v1873_v9  ;;  %v3648_v9 = vld [vmem:[%s4282_s10] sm:$0xff]  }
 0x78f   : > { %v3712_v10 = vpop.eup %3711 }
 0x790   : > { %v1875_v0 = vsel %vm1455_vm2, %v3712_v10, 0.0 }
 0x791   : > { %1876 = vadd.xlane.f32.xlu0 %v1875_v0  ;;  %v3649_v0 = vld [vmem:[%s4282_s10 + $0x48] sm:$0xff]  }
 0x793   : > { %v3714_v11 = vpop.eup %3713 }
 0x794   : > { %v1878_v18 = vsel %vm1455_vm2, %v3714_v11, 0.0 }
 0x795   : > { %1879 = vadd.xlane.f32.xlu1 %v1878_v18 }
 0x81e   : > { %v1877_v19 = vpop.xlane.xlu0 %1876 }
 0x81f   : > { %3715 = vrcp.f32 %v1877_v19  ;;  %v3650_v19 = vld [vmem:[%s4282_s10 + $0x8] sm:$0xff]  }
 0x822   : > { %v1880_v20 = vpop.xlane.xlu1 %1879 }
 0x823   : > { %3717 = vrcp.f32 %v1880_v20  ;;  %v3664_v20 = vld [vmem:[%s4282_s10 + $0x80] sm:$0xff]  }
 0x829   : > { %v3716_v21 = vpop.eup %3715 }
 0x82a   : > { %v1883_v22 = vmul.f32 %v3716_v21, %v3712_v10 }
 0x82c   : > { %v1885_v23 = vpack.c.bf16 %v1883_v22, %v1883_v22  ;;  %v3651_v22 = vld [vmem:[%s4282_s10 + $0x50] sm:$0xff]  }
 0x82d   : > { %v3718_v24 = vpop.eup %3717 }
 0x82e   : > { %v1884_v27 = vmul.f32 %v3718_v24, %v3714_v11  ;;  %3345 = vmatmul.mubr.msk.bf16.vlgmr.msra.gmra.mrb[32].mxu0 %vm1455_vm2, %v1885_v23  ;;  %v3665_v23 = vld [vmem:[%s4282_s10 + $0xc8] sm:$0xff]   ;;  %v3652_v24 = vld [vmem:[%s4282_s10 + $0x10] sm:$0xff]  }
 0x82f   : > { %3355 = vmatpush3.bf16.xpose.msra.mxu0 %v1981_v25  ;;  %3356 = vmatprep.mubr.msk.bf16.mxu0 %vm4004_vm0, %v4003_v37  ;;  %v3666_v25 = vld [vmem:[%s4282_s10 + $0x88] sm:$0xff]  }
 0x830   : > { %v1886_v28 = vpack.c.bf16 %v1884_v27, %v1884_v27  ;;  %3366 = vmatprep.subr.bf16.mxu0 %v4003_v37  ;;  %v3668_v27 = vld [vmem:[%s4282_s10 + $0x90] sm:$0xff]  }
 0x832   : > { %3351 = vmatmul.mubr.msk.bf16.vlgmr.msra.gmra.mrb[32].mxu1 %vm1455_vm2, %v1886_v28  ;;  %v3655_v28 = vld [vmem:[%s4282_s10 + $0x60] sm:$0xff]  }
 0x833   : > { %3361 = vmatpush3.bf16.xpose.msra.mxu1 %v2025_v29  ;;  %3362 = vmatprep.mubr.msk.bf16.mxu1 %vm4004_vm0, %v4003_v37  ;;  %v3669_v29 = vld [vmem:[%s4282_s10 + $0xd8] sm:$0xff]  }
 0x834   : > { %3372 = vmatprep.subr.bf16.mxu1 %v4003_v37 }
 0x836   : > { %3357 = vmatmul.mubr.bf16.vlgmr.msra.gmra.mrb[36].mxu0 %v1979_v30  ;;  %v3656_v30 = vld [vmem:[%s4282_s10 + $0x20] sm:$0xff]  }
 0x837   : > { %3367 = vmatpush3.bf16.msra.mxu0 %v4531_v14  ;;  %3368 = vmatprep.mubr.msk.bf16.mxu0 %vm4004_vm0, %v4003_v37 }
 0x838   : > { %3220 = vmatprep.subr.bf16.mxu0 %v3647_v2 }
 0x83a   : > { %3363 = vmatmul.mubr.bf16.vlgmr.msra.gmra.mrb[36].mxu1 %v2023_v31  ;;  %v3670_v31 = vld [vmem:[%s4282_s10 + $0x98] sm:$0xff]  }
 0x83b   : > { %3373 = vmatpush3.bf16.msra.mxu1 %v4534_v16  ;;  %3374 = vmatprep.mubr.msk.bf16.mxu1 %vm4004_vm0, %v4003_v37 }
 0x83c   : > { %3242 = vmatprep.subr.bf16.mxu1 %v3663_v40 }
 0x901   : > { %v4616_v32 = vpop.f32.mrb[32].mxu0 }
 0x902   : > { %v3346_v33 = vpop.f32.mrb[33].mxu0 }
 0x903   : > { %v1930_v3 = vpop.f32.mrb[34].mxu0  ;;  %v3657_v33 = vld [vmem:[%s4282_s10 + $0x68] sm:$0xff]  }
 0x904   : > { %v3347_v34 = vpop.f32.mrb[35].mxu0  ;;  %v3671_v3 = vld [vmem:[%s4282_s10 + $0xe0] sm:$0xff]  }
 0x905   : > { %v4618_v35 = vpop.f32.mrb[32].mxu1  ;;  %v3658_v34 = vld [vmem:[%s4282_s10 + $0x28] sm:$0xff]  }
 0x906   : > { %v2189_v14 = vpack.c.bf16 %v4618_v35, %v4616_v32  ;;  %v3352_v36 = vpop.f32.mrb[33].mxu1 }
 0x907   : > { %v1976_v41 = vpop.f32.mrb[34].mxu1  ;;  %v3672_v36 = vld [vmem:[%s4282_s10 + $0xa0] sm:$0xff]  }
 0x908   : > { %v3353_v42 = vpop.f32.mrb[35].mxu1  ;;  %v3659_v41 = vld [vmem:[%s4282_s10 + $0x70] sm:$0xff]  }
 0x909   : > { %v2017_v6 = vpop.f32.mrb[36].mxu0  ;;  %v3673_v42 = vld [vmem:[%s4282_s10 + $0xe8] sm:$0xff]  }
 0x90a   : > { %v2067_v43 = vmul.f32 0.35355338, %v2017_v6  ;;  %v3358_v44 = vpop.f32.mrb[37].mxu0  ;;  %v3660_v6 = vld [vmem:[%s4282_s10 + $0x30] sm:$0xff]  }
 0x90b   : > { %v2020_v16 = vpop.f32.mrb[38].mxu0  ;;  %v3661_v44 = vld [vmem:[%s4282_s10 + $0x78] sm:$0xff]  }
 0x90c   : > { %v3359_v45 = vpop.f32.mrb[39].mxu0  ;;  %v2069_v47 = vsel %vm1455_vm2, %v2067_v43, -inf  ;;  %v3662_v16 = vld [vmem:[%s4282_s10 + $0x38] sm:$0xff]  }
 0x90d   : > { %v2061_v48 = vpop.f32.mrb[36].mxu1  ;;  %2070 = vmax.xlane.f32.xlu0 %v2069_v47  ;;  %v3675_v45 = vld [vmem:[%s4282_s10 + $0xf0] sm:$0xff]  }
 0x90e   : > { %v2068_v49 = vmul.f32 0.35355338, %v2061_v48  ;;  %v3364_v52 = vpop.f32.mrb[37].mxu1  ;;  %v3676_v47 = vld [vmem:[%s4282_s10 + $0xb0] sm:$0xff]   ;;  %v3677_v48 = vld [vmem:[%s4282_s10 + $0xf8] sm:$0xff]  }
 0x90f   : > { %v2064_v54 = vpop.f32.mrb[38].mxu1 }
 0x910   : > { %v3365_v55 = vpop.f32.mrb[39].mxu1  ;;  %v2072_v56 = vsel %vm1455_vm2, %v2068_v49, -inf }
 0x911   : > { %2073 = vmax.xlane.f32.xlu1 %v2072_v56 }
 0x99a   : > { %v2071_v13 = vpop.xlane.xlu0 %2070 }
 0x99b   : > { %v2075_v57 = vsub.f32 %v2067_v43, %v2071_v13  ;;  %v3674_v43 = vld [vmem:[%s4282_s10 + $0xa8] sm:$0xff]  }
 0x99d   : > { %v2077_v58 = vmul.f32 1.442695, %v2075_v57 }
 0x99e   : > { %v2074_v15 = vpop.xlane.xlu1 %2073 }
 0x99f   : > { %3719 = vpow2.f32 %v2077_v58  ;;  %v2076_v59 = vsub.f32 %v2068_v49, %v2074_v15  ;;  %v3678_v49 = vld [vmem:[%s4282_s10 + $0xb8] sm:$0xff]  }
 0x9a1   : > { %v2079_v51 = vmul.f32 1.442695, %v2076_v59 }
 0x9a3   : > { %3721 = vpow2.f32 %v2079_v51 }
 0x9a9   : > { %v3720_v60 = vpop.eup %3719 }
 0x9aa   : > { %v2081_v61 = vsel %vm1455_vm2, %v3720_v60, 0.0 }
 0x9ab   : > { %2082 = vadd.xlane.f32.xlu0 %v2081_v61 }
 0x9ad   : > { %v3722_v53 = vpop.eup %3721 }
 0x9ae   : > { %v2084_v1 = vsel %vm1455_vm2, %v3722_v53, 0.0 }
 0x9af   : > { %2085 = vadd.xlane.f32.xlu1 %v2084_v1 }
 0xa38   : > { %v2083_v4 = vpop.xlane.xlu0 %2082 }
 0xa39   : > { %3723 = vrcp.f32 %v2083_v4 }
 0xa3c   : > { %v2086_v5 = vpop.xlane.xlu1 %2085 }
 0xa3d   : > { %3725 = vrcp.f32 %v2086_v5 }
 0xa43   : > { %v3724_v7 = vpop.eup %3723 }
 0xa44   : > { %v2089_v8 = vmul.f32 %v3724_v7, %v3720_v60 }
 0xa46   : > { %v2091_v10 = vpack.c.bf16 %v2089_v8, %v2089_v8 }
 0xa47   : > { %v3726_v11 = vpop.eup %3725 }
 0xa48   : > { %v2090_v18 = vmul.f32 %v3726_v11, %v3722_v53  ;;  %3369 = vmatmul.mubr.msk.bf16.vlgmr.msra.gmra.mrb[40].mxu0 %vm1455_vm2, %v2091_v10  ;;  %v2257_v53 = vsub.s32 1, %v4460_v39  ;;  %v3735_v10 = vld [vmem:[#allocation12] sm:$0xff]  ;;  %v3736_v11 = vld [vmem:[#allocation12 + $0x8] sm:$0xff] }
 0xa49   : > { %3221 = vmatpush3.bf16.msra.mxu0 %v3648_v9  ;;  %2483 = vmatprep.mubr.bf16.mxu0 %v2188_v50  ;;  %v3654_v50 = vld [vmem:[%s4282_s10 + $0x18] sm:$0xff]  }
 0xa4a   : > { %3222 = vmatprep.subr.bf16.mxu0 %v3649_v0  ;;  %v2092_v21 = vpack.c.bf16 %v2090_v18, %v2090_v18  ;;  %v2258_v1 = vrot.slane %v4466_v26, %v2257_v53  ;;  %v3680_v26 = vld [vmem:[%s4289_s9 + $0x8] sm:$0xff]   ;;  %v3693_v53 = vld [vmem:[%s4291_s21 + $0x30] sm:$0xff]  }
 0xa4c   : > { %3375 = vmatmul.mubr.msk.bf16.vlgmr.msra.gmra.mrb[40].mxu1 %vm1455_vm2, %v2092_v21 }
 0xa4d   : > { %3223 = vmatpush3.bf16.msra.mxu0 %v3650_v19  ;;  %3243 = vmatpush3.bf16.msra.mxu1 %v3664_v20  ;;  %v3679_v19 = vld [vmem:[%s4289_s9] sm:$0xff]   ;;  %v418_v20 = vand.u32 127, %v417_v38 }
 0xa4e   : > { %3224 = vmatprep.subr.bf16.mxu0 %v3651_v22  ;;  %3244 = vmatprep.subr.bf16.mxu1 %v3665_v23 }
 0xa4f   : > { %vm419_vm3 = vcmp.lt.s32.totalorder %v418_v20, 32 }
 0xa51   : > { %3225 = vmatpush3.bf16.msra.mxu0 %v3652_v24  ;;  %3245 = vmatpush3.bf16.msra.mxu1 %v3666_v25  ;;  %v4683_v24 = vsel %vm419_vm3, 1.0, %v4003_v37 }
 0xa52   : > { %3226 = vmatprep.subr.bf16.mxu0 %v3653_v46  ;;  %3246 = vmatprep.subr.bf16.mxu1 %v3667_v12 }
 0xa55   : > { %3227 = vmatpush3.bf16.msra.mxu0 %v3654_v50  ;;  %3247 = vmatpush3.bf16.msra.mxu1 %v3668_v27 }
 0xa56   : > { %3228 = vmatprep.subr.bf16.mxu0 %v3655_v28  ;;  %3248 = vmatprep.subr.bf16.mxu1 %v3669_v29  ;;  %v3681_v29 = vld [vmem:[%s4289_s9 + $0x10] sm:$0xff]  }
 0xa59   : > { %3229 = vmatpush3.bf16.msra.mxu0 %v3656_v30  ;;  %3249 = vmatpush3.bf16.msra.mxu1 %v3670_v31  ;;  %v3682_v30 = vld [vmem:[%s4289_s9 + $0x18] sm:$0xff]   ;;  %v3683_v31 = vld [vmem:[%s4289_s9 + $0x20] sm:$0xff]  }
 0xa5a   : > { %3230 = vmatprep.subr.bf16.mxu0 %v3657_v33  ;;  %3250 = vmatprep.subr.bf16.mxu1 %v3671_v3  ;;  %v3684_v33 = vld [vmem:[%s4289_s9 + $0x28] sm:$0xff]   ;;  %v3685_v3 = vld [vmem:[%s4289_s9 + $0x30] sm:$0xff]  }
 0xa5d   : > { %3231 = vmatpush3.bf16.msra.mxu0 %v3658_v34  ;;  %3251 = vmatpush3.bf16.msra.mxu1 %v3672_v36  ;;  %v3686_v34 = vld [vmem:[%s4289_s9 + $0x38] sm:$0xff]   ;;  %v3687_v36 = vld [vmem:[%s4291_s21] sm:$0xff]  }
 0xa5e   : > { %3232 = vmatprep.subr.bf16.mxu0 %v3659_v41  ;;  %3252 = vmatprep.subr.bf16.mxu1 %v3673_v42  ;;  %v3688_v41 = vld [vmem:[%s4291_s21 + $0x8] sm:$0xff]   ;;  %v3689_v42 = vld [vmem:[%s4291_s21 + $0x10] sm:$0xff]  }
 0xa61   : > { %3233 = vmatpush3.bf16.msra.mxu0 %v3660_v6  ;;  %3253 = vmatpush3.bf16.msra.mxu1 %v3674_v43  ;;  %v3690_v6 = vld [vmem:[%s4291_s21 + $0x18] sm:$0xff]   ;;  %v3691_v43 = vld [vmem:[%s4291_s21 + $0x20] sm:$0xff]  }
 0xa62   : > { %3234 = vmatprep.subr.bf16.mxu0 %v3661_v44  ;;  %3254 = vmatprep.subr.bf16.mxu1 %v3675_v45  ;;  %v3692_v44 = vld [vmem:[%s4291_s21 + $0x28] sm:$0xff]  }
 0xa65   : > { %3235 = vmatpush3.bf16.msra.mxu0 %v3662_v16  ;;  %3255 = vmatpush3.bf16.msra.mxu1 %v3676_v47 }
 0xa66   : > { %3378 = vmatprep.subr.bf16.mxu0 %v4003_v37  ;;  %3256 = vmatprep.subr.bf16.mxu1 %v3677_v48 }
 0xa68   : > { %2484 = vmatmul.mubr.bf16.vlgmr.msra.gmra.mrb[44].mxu0 %v2187_v63 }
 0xa69   : > { %3394 = vmatprep.mubr.msk.bf16.mxu0 %vm4004_vm0, %v4003_v37  ;;  %3257 = vmatpush3.bf16.msra.mxu1 %v3678_v49 }
 0xa6a   : > { %3398 = vmatprep.subr.bf16.mxu1 %v4003_v37  ;;  %3379 = vmatpush3.bf16.msra.mxu0 %v3679_v19 }
 0xa6b   : > { %3380 = vmatprep.subr.bf16.mxu0 %v4003_v37 }
 0xa6e   : > { %3381 = vmatpush3.bf16.msra.mxu0 %v3680_v26 }
 0xa6f   : > { %3382 = vmatprep.subr.bf16.mxu0 %v4003_v37 }
 0xa72   : > { %3383 = vmatpush3.bf16.msra.mxu0 %v3681_v29 }
 0xa73   : > { %3384 = vmatprep.subr.bf16.mxu0 %v4003_v37 }
 0xa76   : > { %3385 = vmatpush3.bf16.msra.mxu0 %v3682_v30 }
 0xa77   : > { %3386 = vmatprep.subr.bf16.mxu0 %v4003_v37 }
 0xa7a   : > { %3387 = vmatpush3.bf16.msra.mxu0 %v3683_v31 }
 0xa7b   : > { %3388 = vmatprep.subr.bf16.mxu0 %v4003_v37 }
 0xa7e   : > { %3389 = vmatpush3.bf16.msra.mxu0 %v3684_v33 }
 0xa7f   : > { %3390 = vmatprep.subr.bf16.mxu0 %v4003_v37 }
 0xa82   : > { %3391 = vmatpush3.bf16.msra.mxu0 %v3685_v3 }
 0xa83   : > { %3392 = vmatprep.subr.bf16.mxu0 %v4003_v37 }
 0xa86   : > { %3393 = vmatpush3.bf16.msra.mxu0 %v3686_v34 }
 0xb1b   : > { %v2134_v52 = vpop.f32.mrb[40].mxu0 }
 0xb1c   : > { %v3370_v54 = vpop.f32.mrb[41].mxu0 }
 0xb1d   : > { %v2137_v55 = vpop.f32.mrb[42].mxu0  ;;  %v2561_v54 = vsub.s32 2, %v4460_v39 }
 0xb1e   : > { %v3371_v56 = vpop.f32.mrb[43].mxu0  ;;  %v4712_v55 = vld [vmem:[%s4337_s14] sm:$0xff] }
 0xb1f   : > { %v2181_v13 = vpop.f32.mrb[40].mxu1  ;;  %v2562_v56 = vrot.slane %v4712_v55, %v2561_v54 }
 0xb20   : > { %v2190_v17 = vpack.c.bf16 %v2181_v13, %v2134_v52  ;;  %v3376_v62 = vpop.f32.mrb[41].mxu1  ;;  %v2567_v13 = vsub.s32 3, %v4460_v39 }
 0xb21   : > { %v2184_v63 = vpop.f32.mrb[42].mxu1 }
 0xb22   : > { %v3377_v57 = vpop.f32.mrb[43].mxu1  ;;  %2524 = vmatprep.mubr.bf16.mxu1 %v2190_v17 }
 0xb23   : > { %2525 = vmatmul.mubr.bf16.vlgmr.msra.gmra.mrb[44].mxu1 %v2189_v14 }
 0xb24   : > { %3414 = vmatprep.mubr.msk.bf16.mxu1 %vm4004_vm0, %v4003_v37  ;;  %3399 = vmatpush3.bf16.msra.mxu1 %v3687_v36 }
 0xb25   : > { %3400 = vmatprep.subr.bf16.mxu1 %v4003_v37 }
 0xb28   : > { %3401 = vmatpush3.bf16.msra.mxu1 %v3688_v41 }
 0xb29   : > { %3402 = vmatprep.subr.bf16.mxu1 %v4003_v37 }
 0xb2c   : > { %3403 = vmatpush3.bf16.msra.mxu1 %v3689_v42 }
 0xb2d   : > { %3404 = vmatprep.subr.bf16.mxu1 %v4003_v37 }
 0xb30   : > { %3405 = vmatpush3.bf16.msra.mxu1 %v3690_v6  ;;  %v2821_v6 = vsub.s32 6, %v4460_v39 }
 0xb31   : > { %3406 = vmatprep.subr.bf16.mxu1 %v4003_v37 }
 0xb34   : > { %3407 = vmatpush3.bf16.msra.mxu1 %v3691_v43  ;;  %v2827_v43 = vsub.s32 7, %v4460_v39 }
 0xb35   : > { %3408 = vmatprep.subr.bf16.mxu1 %v4003_v37 }
 0xb38   : > { %3409 = vmatpush3.bf16.msra.mxu1 %v3692_v44 }
 0xb39   : > { %3410 = vmatprep.subr.bf16.mxu1 %v4003_v37 }
 0xb3b   : > { %v3236_v58 = vpop.f32.mrb[44].mxu0 }
 0xb3c   : > { %v3237_v15 = vpop.f32.mrb[45].mxu0  ;;  %3411 = vmatpush3.bf16.msra.mxu1 %v3693_v53 }
 0xb3d   : > { %v3238_v59 = vadd.f32 %v3237_v15, %v3236_v58  ;;  %v3239_v51 = vpop.f32.mrb[46].mxu0  ;;  %v2568_v15 = vrot.slane %v4712_v55, %v2567_v13  ;;  %3412 = vmatprep.subr.bf16.mxu1 %v4003_v37 }
 0xb3e   : > { %v3240_v60 = vpop.f32.mrb[47].mxu0 }
 0xb3f   : > { %v3241_v61 = vadd.f32 %v3240_v60, %v3239_v51  ;;  %v2486_v4 = vadd.f32 %v3238_v59, %v2258_v1 }
 0xb41   : > { %v2489_v5 = vadd.f32 %v3241_v61, %v2258_v1  ;;  %v3694_v1 = vld [vmem:[%s4291_s21 + $0x38] sm:$0xff]  }
 0xb42   : > { %3413 = vmatpush3.bf16.msra.mxu1 %v3694_v1 }
 0xbf6   : > { %v3258_v2 = vpop.f32.mrb[44].mxu1 }
 0xbf7   : > { %v3259_v40 = vpop.f32.mrb[45].mxu1 }
 0xbf8   : > { %v3260_v32 = vadd.f32 %v3259_v40, %v3258_v2  ;;  %v3261_v35 = vpop.f32.mrb[46].mxu1  ;;  %v2590_v2 = vsub.s32 4, %v4460_v39 }
 0xbf9   : > { %v3262_v14 = vpop.f32.mrb[47].mxu1 }
 0xbfa   : > { %v2527_v7 = vadd.f32 %v3260_v32, %v2486_v4  ;;  %v3263_v8 = vadd.f32 %v3262_v14, %v3261_v35  ;;  %v2591_v40 = vrot.slane %v4712_v55, %v2590_v2 }
 0xbfc   : > { %v2530_v9 = vadd.f32 %v3263_v8, %v2489_v5  ;;  %v2533_v0 = vadd.f32 %v3735_v10, %v2527_v7 }
 0xbfe   : > { %2535 = vadd.xlane.f32.xlu0 %v2533_v0  ;;  %v2534_v18 = vadd.f32 %v3736_v11, %v2530_v9 }
 0xc00   : > { %2537 = vadd.xlane.f32.xlu1 %v2534_v18 }
 0xc8b   : > { %v2536_v21 = vpop.xlane.xlu0 %2535 }
 0xc8c   : > { %v2539_v22 = vmul.f32 0.03125, %v2536_v21 }
 0xc8d   : > { %v2538_v23 = vpop.xlane.xlu1 %2537 }
 0xc8e   : > { %v2541_v25 = vsub.f32 %v2533_v0, %v2539_v22  ;;  %v2540_v46 = vmul.f32 0.03125, %v2538_v23  ;;  %v2702_v0 = vsub.s32 5, %v4460_v39 }
 0xc90   : > { %v2542_v12 = vsub.f32 %v2534_v18, %v2540_v46  ;;  %v2543_v50 = vmul.f32 %v4683_v24, %v2541_v25  ;;  %v2703_v37 = vrot.slane %v4712_v55, %v2702_v0 }
 0xc92   : > { %v2545_v27 = vmul.f32 %v2543_v50, %v2543_v50  ;;  %v2544_v28 = vmul.f32 %v4683_v24, %v2542_v12 }
 0xc94   : > { %2547 = vadd.xlane.f32.xlu0 %v2545_v27  ;;  %v2546_v38 = vmul.f32 %v2544_v28, %v2544_v28 }
 0xc96   : > { %2549 = vadd.xlane.f32.xlu1 %v2546_v38 }
 0xd21   : > { %v2548_v16 = vpop.xlane.xlu0 %2547 }
 0xd22   : > { %v2551_v45 = vmul.f32 0.03125, %v2548_v16 }
 0xd23   : > { %v2550_v47 = vpop.xlane.xlu1 %2549 }
 0xd24   : > { %v2553_v48 = vadd.f32 1e-05, %v2551_v45  ;;  %v2552_v49 = vmul.f32 0.03125, %v2550_v47  ;;  %v2828_v45 = vrot.slane %v4712_v55, %v2827_v43 }
 0xd26   : > { %3727 = vrsqrt.f32 %v2553_v48  ;;  %v2554_v52 = vadd.f32 1e-05, %v2552_v49 }
 0xd28   : > { %3729 = vrsqrt.f32 %v2554_v52 }
 0xd30   : > { %v3728_v17 = vpop.eup %3727 }
 0xd31   : > { %v2557_v62 = vmul.f32 %v3728_v17, %v2543_v50 }
 0xd32   : > { %v3730_v63 = vpop.eup %3729 }
 0xd33   : > { %v2558_v57 = vmul.f32 %v3730_v63, %v2544_v28  ;;  %v2563_v58 = vmul.f32 %v2562_v56, %v2557_v62 }
 0xd35   : > { %v2564_v59 = vmul.f32 %v2562_v56, %v2558_v57  ;;  %v2569_v51 = vadd.f32 %v2568_v15, %v2563_v58 }
 0xd37   : > { %v2570_v60 = vadd.f32 %v2568_v15, %v2564_v59 }
 0xd39   : > { %v2571_v61 = vpack.c.bf16 %v2570_v60, %v2569_v51 }
 0xd3b   : > { %3395 = vmatmul.mubr.bf16.vlgmr.msra.gmra.mrb[48].mxu0 %v2571_v61 }
 0xe0e   : > { %v2674_v4 = vpop.f32.mrb[48].mxu0 }
 0xe0f   : > { %v2675_v32 = vadd.f32 %v2674_v4, %v2591_v40  ;;  %v3396_v35 = vpop.f32.mrb[49].mxu0 }
 0xe10   : > { %v2677_v14 = vpop.f32.mrb[50].mxu0 }
 0xe11   : > { %v2678_v5 = vadd.f32 %v2677_v14, %v2591_v40  ;;  %v3397_v7 = vpop.f32.mrb[51].mxu0  ;;  %v2681_v8 = vmax.f32 %v2675_v32, 0.0 }
 0xe13   : > { %v2682_v9 = vmax.f32 %v2678_v5, 0.0 }
 0xe15   : > { %v2683_v10 = vpack.c.bf16 %v2682_v9, %v2681_v8 }
 0xe17   : > { %3415 = vmatmul.mubr.bf16.vlgmr.msra.gmra.mrb[48].mxu1 %v2683_v10 }
 0xeea   : > { %v2786_v11 = vpop.f32.mrb[48].mxu1 }
 0xeeb   : > { %v2787_v18 = vadd.f32 %v2786_v11, %v2703_v37  ;;  %v3416_v19 = vpop.f32.mrb[49].mxu1 }
 0xeec   : > { %v2789_v26 = vpop.f32.mrb[50].mxu1 }
 0xeed   : > { %v2790_v20 = vadd.f32 %v2789_v26, %v2703_v37  ;;  %v3417_v21 = vpop.f32.mrb[51].mxu1  ;;  %v2793_v22 = vadd.f32 %v2787_v18, %v2569_v51 }
 0xeef   : > { %2795 = vadd.xlane.f32.xlu0 %v2793_v22  ;;  %v2794_v23 = vadd.f32 %v2790_v20, %v2570_v60 }
 0xef1   : > { %2797 = vadd.xlane.f32.xlu1 %v2794_v23 }
 0xf7c   : > { %v2796_v25 = vpop.xlane.xlu0 %2795 }
 0xf7d   : > { %v2799_v46 = vmul.f32 0.03125, %v2796_v25 }
 0xf7e   : > { %v2798_v12 = vpop.xlane.xlu1 %2797 }
 0xf7f   : > { %v2801_v50 = vsub.f32 %v2793_v22, %v2799_v46  ;;  %v2800_v27 = vmul.f32 0.03125, %v2798_v12 }
 0xf81   : > { %v2802_v28 = vsub.f32 %v2794_v23, %v2800_v27  ;;  %v2803_v38 = vmul.f32 %v4683_v24, %v2801_v50 }
 0xf83   : > { %v2805_v29 = vmul.f32 %v2803_v38, %v2803_v38  ;;  %v2804_v30 = vmul.f32 %v4683_v24, %v2802_v28  ;;  %v2822_v24 = vrot.slane %v4712_v55, %v2821_v6 }
 0xf85   : > { %2807 = vadd.xlane.f32.xlu0 %v2805_v29  ;;  %v2806_v31 = vmul.f32 %v2804_v30, %v2804_v30 }
 0xf87   : > { %2809 = vadd.xlane.f32.xlu1 %v2806_v31 }
0x1012   : > { %v2808_v33 = vpop.xlane.xlu0 %2807 }
0x1013   : > { %v2811_v3 = vmul.f32 0.03125, %v2808_v33 }
0x1014   : > { %v2810_v34 = vpop.xlane.xlu1 %2809 }
0x1015   : > { %v2813_v36 = vadd.f32 1e-05, %v2811_v3  ;;  %v2812_v41 = vmul.f32 0.03125, %v2810_v34 }
0x1017   : > { %3731 = vrsqrt.f32 %v2813_v36  ;;  %v2814_v42 = vadd.f32 1e-05, %v2812_v41 }
0x1019   : > { %3733 = vrsqrt.f32 %v2814_v42 }
0x1021   : > { %v3732_v44 = vpop.eup %3731 }
0x1022   : > { %v2817_v16 = vmul.f32 %v3732_v44, %v2803_v38 }
0x1023   : > { %v3734_v47 = vpop.eup %3733 }
0x1024   : > { %v2823_v48 = vmul.f32 %v2822_v24, %v2817_v16  ;;  %v2818_v49 = vmul.f32 %v3734_v47, %v2804_v30 }
0x1026   : > { %v2824_v52 = vmul.f32 %v2822_v24, %v2818_v49  ;;  %v2829_v54 = vadd.f32 %v2828_v45, %v2823_v48 }
0x1028   : > { %v2830_v56 = vadd.f32 %v2828_v45, %v2824_v52  ;;  %2831 = vst [vmem:[#allocation12] sm:$0xff] %v2829_v54 }
0x102a   : > { %2832 = vst [vmem:[#allocation12 + $0x8] sm:$0xff] %v2830_v56 }
0x102b   : > { %3927 = shalt.err (!%p3924_p1)
}
0x102c   : > { %s3928_s8 = scalar_lea.hbm %s4778_s6, 256 }
0x102d   : > { %p3929_p5 = scmp.ne.s32.totalorder %s4778_s6, %s3928_s8  ;;  %p3934_p7 = scmp.lt.u32.totalorder %s3928_s8, %s4778_s6 }
0x102f   : > { %p3930_p2 = pnand %p3929_p5, %p3459_p13 }
0x1031   : > { %p3931_p6 = pneg %p3930_p2 }
0x1033   : > { %p3936_p12 = pnand %p3934_p7, %p3931_p6 }
0x1035   : > { %3939 = shalt.err (!%p3936_p12)
}
0x1036   : > { %s4005_s18 = smov 128   ;;  %s4006_s21 = smov 8  }
0x1037   : > { %3438 = dma.vmem_to_hbm [thread:$0]  (%p3459_p13), %s4298_s4, 256, %s4778_s6, [#allocation5], %s4005_s18, %s4005_s18, %s4006_s21  }
0x1038   : > { %3973 = dma.done.wait (%p3459_p13), [#allocation5], 256  }
0x1039   : > { %3975 = vsyncadd (%p3459_p13), [#allocation5], 4294967040 }
0x103a PF: > { %s4813_s24 = sld [smem:[#allocation23_spill]]  ;;  %s4814_s13 = sld [smem:[#allocation22_spill]] }
0x103b   : > { %s4815_s23 = sld [smem:[#allocation24_spill]]  ;;  %s4816_s21 = smov %s3982_s22 }
0x1040   : > { %p23_p4 = scmp.ge.s32.totalorder %s4813_s24, 4   ;;  %s4817_s22 = smov %s4814_s13 }
0x1042   :  { %25 = sbr.rel (!%p23_p4) target bundleno = 11 (0xb), region = 133 }
0x1049   :  { %2855 = vsyncpa [#allocation4], 1 }
0x104a   :  { %2857 = vsyncpa [#allocation4 + $0x1], 1 }
0x104b   :  { %2858 = vsyncpa [#allocation7], 1 }
0x104c   :  { %2860 = vsyncpa [#allocation7 + $0x1], 1 }
0x104d   :  { %2861 = vsyncpa [#allocation10], 1 }
0x104e   :  { %2863 = vsyncpa [#allocation10 + $0x1], 1 }
0x104f   :  { %2864 = vsyncpa [#allocation5], 1 }
0x1050   :  { %2866 = vsyncpa [#allocation5 + $0x1], 1 }
0x1051   :  { %2867 = vsyncmov [#allocation2] }
0x1054   :  { %s2868_s25 = vpop.sfrf %2867 }
0x1055   :  { %p3172_p10 = scmp.ne.s32.totalorder %s2868_s25, 0 }
0x1057   :  { %2872 = shalt.err (%p3172_p10)  }

</bundles_post_ra>
